<compile_context>
chip_gen: v7x
topology: tpu7x:2x2x1
jax: 0.10.0
libtpu: 0.0.40
codegen_flags: <defaults>
</compile_context>

<pallas_src>
import math
from functools import partial

import jax
import jax.numpy as jnp
from jax import lax
from jax.experimental import pallas as pl
from jax.experimental.pallas import tpu as pltpu

# bf16 operands feed the MXU fast path; accumulation stays f32.
MATMUL_DTYPE = jnp.bfloat16
# Safe on every generation (v7x default scoped VMEM is 32 MiB; raises v5e's 16 MiB default).
_VMEM_LIMIT = 32 << 20


# --------------------------- MVKE bottom layer kernel ---------------------------
def _pick_tb(B, F, E, VK, target_rows=512, budget_bytes=8 << 20):
    """Batch tile TB (divisor of B).  TB is a multiple of 16 (bf16 sublane tile of the
    lane-dense (VK, TB, F*E) output block) and <= B//2 so the 'parallel' grid axis has
    >= 2 steps (v7x has 2 TensorCores); falls back to TB == B for tiny batches.
    budget_bytes is sized for v7x's 64 MiB VMEM; v6e/v5e could go larger."""
    best = None
    for tb in range(16, B // 2 + 1, 16):
        if B % tb:
            continue
        blk = 4 * tb * F * E * (2 + 2 * VK)     # rough f32 per-step working set
        if blk > budget_bytes:
            break
        best = tb
        if tb * F >= target_rows:
            break
    return best if best is not None else B


def _bottom_kernel(F, E, VK, TB, flat_ref, wcat_ref, bcat_ref, g_ref, b_ref, out_ref):
    md = MATMUL_DTYPE
    flat = flat_ref[...]                                              # [TB*F, E] f32
    # One fused MXU matmul: [V-projection | folded attention scores].
    r = jnp.dot(flat.astype(md), wcat_ref[...],
                preferred_element_type=jnp.float32) + bcat_ref[...]   # [TB*F, E+VK]
    v = r[:, :E]                                                      # [TB*F, E]
    sc = r[:, E:].T.reshape(VK, TB, F)                                # small relayout only
    # Per-(vk, batch) softmax over the feature axis (lane reduce) + EUP reciprocal.
    m = jnp.max(sc, axis=-1, keepdims=True)
    e = jnp.exp(sc - m)
    attn = e * pl.reciprocal(jnp.sum(e, axis=-1, keepdims=True), approx=True)
    # Attention-weighted values + residual, LayerNorm (eps=1e-5) over E, tile-wide.
    y = attn[..., None] * v.reshape(1, TB, F, E) + flat.reshape(1, TB, F, E)
    mu = jnp.mean(y, axis=-1, keepdims=True)
    var = jnp.mean((y - mu) ** 2, axis=-1, keepdims=True)
    yn = (y - mu) * lax.rsqrt(var + 1e-5) * g_ref[...].reshape(1, 1, 1, E) \
        + b_ref[...].reshape(1, 1, 1, E)
    # Lane-dense store in the expert-consumable layout (VK, TB, F*E).
    out_ref[...] = yn.reshape(VK, TB, F * E).astype(out_ref.dtype)


def mvke_bottom(feats, w_cat, b_cat, ln_g, ln_b):
    B, F, E = feats.shape
    VK = w_cat.shape[1] - E
    TB = _pick_tb(B, F, E, VK)
    flat = feats.reshape(B * F, E)                 # free contiguous XLA reshape
    return pl.pallas_call(
        partial(_bottom_kernel, F, E, VK, TB),
        out_shape=jax.ShapeDtypeStruct((VK, B, F * E), MATMUL_DTYPE),
        grid=(B // TB,),
        in_specs=[
            pl.BlockSpec((TB * F, E), lambda b: (b, 0)),
            pl.BlockSpec((E, E + VK), lambda b: (0, 0)),
            pl.BlockSpec((1, E + VK), lambda b: (0, 0)),
            pl.BlockSpec((1, E), lambda b: (0, 0)),
            pl.BlockSpec((1, E), lambda b: (0, 0)),
        ],
        out_specs=pl.BlockSpec((VK, TB, F * E), lambda b: (0, b, 0)),
        compiler_params=pltpu.CompilerParams(
            dimension_semantics=("parallel",), vmem_limit_bytes=_VMEM_LIMIT),
    )(flat, w_cat.astype(MATMUL_DTYPE), b_cat.astype(jnp.float32), ln_g, ln_b)


# ------------------------------- Expert MLP kernel -------------------------------
def _pick_tk(Din, max_tk=1024):
    """K-tile for the expert first layer: full Din if small, else the largest
    multiple-of-128 divisor of Din that is <= max_tk."""
    if Din <= max_tk:
        return Din
    for tk in range(max_tk - max_tk % 128, 0, -128):
        if Din % tk == 0:
            return tk
    return Din


def _expert_kernel(n_layers, *refs):
    # refs: x, w0, b0, w1, b1, ..., out, acc
    md = MATMUL_DTYPE
    x_ref, out_ref, acc_ref = refs[0], refs[-2], refs[-1]
    wrefs = refs[1:-2]
    k = pl.program_id(1)

    @pl.when(k == 0)
    def _init():
        acc_ref[...] = jnp.zeros_like(acc_ref)

    # K-tiled first layer, f32 VMEM accumulator (weights pre-cast to bf16).
    acc_ref[...] += jnp.dot(x_ref[0].astype(md), wrefs[0][0],
                            preferred_element_type=jnp.float32)

    @pl.when(k == pl.num_programs(1) - 1)
    def _finalize():
        h = acc_ref[...] + wrefs[1][0]
        for i in range(1, n_layers):
            # TODO(synk): nn.Dropout is identity at inference; training-mode dropout
            # is not implemented.
            h = jnp.maximum(h, 0.0)                                   # ReLU
            h = jnp.dot(h.astype(md), wrefs[2 * i][0],
                        preferred_element_type=jnp.float32) + wrefs[2 * i + 1][0]
        out_ref[0] = h.astype(out_ref.dtype)


def expert_forward(x, weights, biases):
    # x: [VK, B, Din] (bf16); weights[i]: [VK, din_i, dout_i]; biases[i]: [VK, 1, dout_i]
    VK, B, Din = x.shape
    O = weights[-1].shape[-1]
    H1 = weights[0].shape[-1]
    n_layers = len(weights)
    TK = _pick_tk(Din)
    args = [x, weights[0].astype(MATMUL_DTYPE), biases[0]]
    in_specs = [
        pl.BlockSpec((1, B, TK), lambda v, k: (v, 0, k)),
        pl.BlockSpec((1, TK, H1), lambda v, k: (v, k, 0)),
        pl.BlockSpec((1, 1, H1), lambda v, k: (v, 0, 0)),
    ]
    for w, b in zip(weights[1:], biases[1:]):
        args.extend([w.astype(MATMUL_DTYPE), b])
        din, dout = w.shape[1], w.shape[2]
        in_specs.append(pl.BlockSpec((1, din, dout), lambda v, k: (v, 0, 0)))
        in_specs.append(pl.BlockSpec((1, 1, dout), lambda v, k: (v, 0, 0)))
    return pl.pallas_call(
        partial(_expert_kernel, n_layers),
        out_shape=jax.ShapeDtypeStruct((VK, B, O), jnp.float32),
        grid=(VK, Din // TK),
        in_specs=in_specs,
        out_specs=pl.BlockSpec((1, B, O), lambda v, k: (v, 0, 0)),
        scratch_shapes=[pltpu.VMEM((B, H1), jnp.float32)],
        compiler_params=pltpu.CompilerParams(
            dimension_semantics=("parallel", "arbitrary"),
            vmem_limit_bytes=_VMEM_LIMIT),
    )(*args)


# --------------------------- Virtual Kernel Gating kernel ---------------------------
def _vkg_kernel(S, starts_ref, tag_ref, vk_ref, exp_ref, out_ref, w_ref):
    md = MATMUL_DTYPE
    start = starts_ref[pl.program_id(0)]                      # per-task VK start (SMEM)
    tag = tag_ref[0]                                          # [B, E]
    sel_vk = vk_ref[pl.ds(start, S)].reshape(S, tag.shape[-1])  # [S, E]
    scores = lax.dot_general(tag.astype(md), sel_vk.astype(md),
                             (((1,), (1,)), ((), ())),
                             preferred_element_type=jnp.float32)  # [B, S]
    m = jnp.max(scores, axis=1, keepdims=True)
    e = jnp.exp(scores - m)
    w = e * pl.reciprocal(jnp.sum(e, axis=1, keepdims=True), approx=True)   # [B, S]
    exp_sel = exp_ref[pl.ds(start, S)].astype(jnp.float32)    # [S, B, O], sliced in place
    out = jnp.sum(w.T[:, :, None] * exp_sel, axis=0)          # [B, O]
    out_ref[0] = out.astype(out_ref.dtype)
    w_ref[0] = w.astype(w_ref.dtype)


def vkg_forward(starts, tag_stack, vk3, expert_out, S):
    # starts: [T] int32 (scalar-prefetched); tag_stack: [T,B,E]; vk3: [VK,1,E];
    # expert_out: [VK,B,O] stays resident and is sliced in-kernel (no per-task stacks).
    T, B, E = tag_stack.shape
    VK = vk3.shape[0]
    O = expert_out.shape[-1]
    return pl.pallas_call(
        partial(_vkg_kernel, S),
        out_shape=(jax.ShapeDtypeStruct((T, B, O), jnp.float32),
                   jax.ShapeDtypeStruct((T, B, S), jnp.float32)),
        grid_spec=pltpu.PrefetchScalarGridSpec(
            num_scalar_prefetch=1,
            grid=(T,),
            in_specs=[pl.BlockSpec((1, B, E), lambda t, starts: (t, 0, 0)),
                      pl.BlockSpec((VK, 1, E), lambda t, starts: (0, 0, 0)),
                      pl.BlockSpec((VK, B, O), lambda t, starts: (0, 0, 0))],
            out_specs=[pl.BlockSpec((1, B, O), lambda t, starts: (t, 0, 0)),
                       pl.BlockSpec((1, B, S), lambda t, starts: (t, 0, 0))],
        ),
        compiler_params=pltpu.CompilerParams(
            dimension_semantics=("parallel",), vmem_limit_bytes=_VMEM_LIMIT),
    )(starts, tag_stack, vk3, expert_out)


# --------------------------------- Parameter init ---------------------------------
def init_params(key, feature_dim, hidden_dims, output_dim, vk_num, num_features):
    E = feature_dim
    keys = jax.random.split(key, 8 + len(hidden_dims) + 1)
    p = {}
    p["virtual_kernels"] = 0.01 * jax.random.normal(keys[0], (vk_num, E), jnp.float32)
    p["bottom"] = {
        "wq": 0.01 * jax.random.normal(keys[1], (E, E), jnp.float32),
        "bq": jnp.zeros((1, E), jnp.float32),
        "wk": 0.01 * jax.random.normal(keys[2], (E, E), jnp.float32),
        "bk": jnp.zeros((1, E), jnp.float32),
        "wv": 0.01 * jax.random.normal(keys[3], (E, E), jnp.float32),
        "bv": jnp.zeros((1, E), jnp.float32),
        "ln_g": jnp.ones((1, E), jnp.float32),
        "ln_b": jnp.zeros((1, E), jnp.float32),
    }
    # non-shared experts: per-VK weights stacked along axis 0
    dims = [num_features * E] + list(hidden_dims) + [output_dim]
    ws, bs = [], []
    for i in range(len(dims) - 1):
        w = jax.random.normal(keys[4 + i], (vk_num, dims[i], dims[i + 1]),
                              jnp.float32) / math.sqrt(float(dims[i]))
        ws.append(w)
        bs.append(jnp.zeros((vk_num, 1, dims[i + 1]), jnp.float32))
    p["expert_ws"] = ws
    p["expert_bs"] = bs
    return p


# ----------------------------------- MVKE forward -----------------------------------
def mvke_forward(params, feature_embeddings, tag_embeddings, task_config):
    B, F, E = feature_embeddings.shape
    p = params["bottom"]
    vk = params["virtual_kernels"]
    VK = vk.shape[0]

    # Hoisted, batch-independent prep (tiny):
    #   q = vk @ Wq + bq ; K is never materialized:
    #   scores = flat @ (Wk @ qT / sqrt(E)) + bk @ (qT / sqrt(E)).
    qT_scaled = (vk @ p["wq"] + p["bq"]).T / math.sqrt(float(E))     # [E, VK]
    wkq = p["wk"] @ qT_scaled                                        # [E, VK]
    bkq = p["bk"] @ qT_scaled                                        # [1, VK]
    # Fuse the V projection and the folded score projection into one MXU operand.
    w_cat = jnp.concatenate([p["wv"], wkq], axis=1)                  # [E, E+VK]
    b_cat = jnp.concatenate([p["bv"], bkq], axis=1)                  # [1, E+VK]

    x = mvke_bottom(feature_embeddings, w_cat, b_cat, p["ln_g"], p["ln_b"])   # [VK,B,F*E]
    expert_out = expert_forward(x, params["expert_ws"], params["expert_bs"])  # [VK,B,O]

    # Group tasks with identical selection width S -> one gating launch per group.
    groups = {}
    for name, (s, e) in task_config.items():
        groups.setdefault(e - s + 1, []).append((name, s))

    vk3 = vk.reshape(VK, 1, E)
    outputs, vke_weights = {}, {}
    for S, items in groups.items():
        names = [n for n, _ in items]
        starts = jnp.asarray([s for _, s in items], dtype=jnp.int32)
        tag_stack = jnp.stack([tag_embeddings[n] for n in names], axis=0)     # [T,B,E]
        outs, ws = vkg_forward(starts, tag_stack, vk3, expert_out, S)
        for i, name in enumerate(names):
            outputs[name] = outs[i]
            vke_weights[name] = ws[i]
    return outputs, vke_weights


# -------------------------------- Pure-JAX reference --------------------------------
def reference_forward(params, feats, tag_embs, task_config):
    B, F, E = feats.shape
    p = params["bottom"]
    vk = params["virtual_kernels"]
    VK = vk.shape[0]
    q = vk @ p["wq"] + p["bq"]
    flat = feats.reshape(-1, E)
    k = flat @ p["wk"] + p["bk"]
    v = flat @ p["wv"] + p["bv"]
    scores = (k @ q.T) / math.sqrt(float(E))
    scores = scores.reshape(B, F, VK)
    attn = jax.nn.softmax(scores, axis=1)[..., None]
    y = attn * v.reshape(B, F, 1, E) + feats[:, :, None, :]
    mu = y.mean(-1, keepdims=True)
    var = ((y - mu) ** 2).mean(-1, keepdims=True)
    mvke = (y - mu) / jnp.sqrt(var + 1e-5) * p["ln_g"] + p["ln_b"]
    exp_outs = []
    n = len(params["expert_ws"])
    for vi in range(VK):
        h = mvke[:, :, vi, :].reshape(B, F * E)
        for i in range(n):
            h = h @ params["expert_ws"][i][vi] + params["expert_bs"][i][vi]
            if i < n - 1:
                h = jnp.maximum(h, 0.0)
        exp_outs.append(h)
    exp_outs = jnp.stack(exp_outs, axis=1)
    outs, wts = {}, {}
    for t, (s, e) in task_config.items():
        sel_vk = vk[s:e + 1]
        sel_exp = exp_outs[:, s:e + 1, :]
        w = jax.nn.softmax(tag_embs[t] @ sel_vk.T, axis=1)
        outs[t] = jnp.einsum("bs,bso->bo", w, sel_exp)
        wts[t] = w
    return outs, wts


if __name__ == "__main__":
    B, F, E = 8, 4, 32           # batch, num_features, feature_dim
    VK = 4                       # vk_num
    hidden_dims = [64, 32]
    output_dim = 16

    key = jax.random.PRNGKey(0)
    kp, kf, kt1, kt2 = jax.random.split(key, 4)
    params = init_params(kp, E, hidden_dims, output_dim, VK, F)
    feature_embeddings = jax.random.normal(kf, (B, F, E), jnp.float32)
    tag_embeddings = {
        "ctr": jax.random.normal(kt1, (B, E), jnp.float32),
        "cvr": jax.random.normal(kt2, (B, E), jnp.float32),
    }
    task_config = {"ctr": (0, 1), "cvr": (2, 3)}

    outputs, weights = mvke_forward(params, feature_embeddings, tag_embeddings, task_config)
    jax.block_until_ready((outputs, weights))

    ref_out, ref_w = reference_forward(params, feature_embeddings, tag_embeddings, task_config)
    # Tolerances sized for bf16 MXU operands with f32 accumulation (3 chained matmuls);
    # the gating weights have almost no bf16-sensitive path and are checked tightly.
    for t in task_config:
        assert outputs[t].shape == (B, output_dim)
        assert weights[t].shape == (B, task_config[t][1] - task_config[t][0] + 1)
        assert jnp.allclose(outputs[t], ref_out[t], atol=3e-2, rtol=2e-2), t
        assert jnp.allclose(weights[t], ref_w[t], atol=2e-3, rtol=2e-2), t

    print("KERNEL_OK")
</pallas_src>

<mosaic_0001>
module attributes {stable_mosaic.version = 11 : i64} {
  func.func @_bottom_kernel(%arg0: i32, %arg1: memref<32x32xf32, #tpu.memory_space<vmem>>, %arg2: memref<32x36xbf16, #tpu.memory_space<vmem>>, %arg3: memref<1x36xf32, #tpu.memory_space<vmem>>, %arg4: memref<1x32xf32, #tpu.memory_space<vmem>>, %arg5: memref<1x32xf32, #tpu.memory_space<vmem>>, %arg6: memref<4x8x128xbf16, #tpu.memory_space<vmem>>) attributes {dimension_semantics = [#tpu.dimension_semantics<parallel>], iteration_bounds = array<i64: 1>, scalar_prefetch = 0 : i64, scratch_operands = 0 : i64, tpu.core_type = #tpu.core_type<tc>, window_params = [{transform_indices = @transform_0, window_bounds = array<i64: 32, 32>}, {pipeline_mode = #tpu.pipeline_mode<synchronous>, transform_indices = @transform_1, window_bounds = array<i64: 32, 36>}, {pipeline_mode = #tpu.pipeline_mode<synchronous>, transform_indices = @transform_2, window_bounds = array<i64: 1, 36>}, {pipeline_mode = #tpu.pipeline_mode<synchronous>, transform_indices = @transform_3, window_bounds = array<i64: 1, 32>}, {pipeline_mode = #tpu.pipeline_mode<synchronous>, transform_indices = @transform_4, window_bounds = array<i64: 1, 32>}, {transform_indices = @transform_5, window_bounds = array<i64: 4, 8, 128>}]} {
    %c0 = arith.constant 0 : index
    %c0_0 = arith.constant 0 : index
    %0 = vector.load %arg1[%c0, %c0_0] : memref<32x32xf32, #tpu.memory_space<vmem>>, vector<32x32xf32>
    %1 = arith.truncf %0 : vector<32x32xf32> to vector<32x32xbf16>
    %c0_1 = arith.constant 0 : index
    %c0_2 = arith.constant 0 : index
    %2 = vector.load %arg2[%c0_1, %c0_2] : memref<32x36xbf16, #tpu.memory_space<vmem>>, vector<32x36xbf16>
    %cst = arith.constant dense<0.000000e+00> : vector<32x36xf32>
    %3 = tpu.matmul %1, %2, %cst {dimension_numbers = #tpu.dot_dimension_numbers<[1], [0], [0], [1], [0, 0, 1, 1], [], []>} : vector<32x32xbf16>, vector<32x36xbf16>, vector<32x36xf32> -> vector<32x36xf32>
    %c0_3 = arith.constant 0 : index
    %c0_4 = arith.constant 0 : index
    %4 = vector.load %arg3[%c0_3, %c0_4] : memref<1x36xf32, #tpu.memory_space<vmem>>, vector<1x36xf32>
    %5 = vector.broadcast %4 : vector<1x36xf32> to vector<32x36xf32>
    %6 = arith.addf %3, %5 : vector<32x36xf32>
    %7 = vector.extract_strided_slice %6 {offsets = [0, 0], sizes = [32, 32], strides = [1, 1]} : vector<32x36xf32> to vector<32x32xf32>
    %8 = vector.extract_strided_slice %6 {offsets = [0, 32], sizes = [32, 4], strides = [1, 1]} : vector<32x36xf32> to vector<32x4xf32>
    %9 = tpu.transpose %8, [1, 0] : vector<32x4xf32> -> vector<4x32xf32>
    %10 = vector.shape_cast %9 : vector<4x32xf32> to vector<4x8x4xf32>
    %cst_5 = arith.constant dense<0xFF800000> : vector<4x8xf32>
    %11 = vector.multi_reduction <maximumf>, %10, %cst_5 [2] : vector<4x8x4xf32> to vector<4x8xf32>
    %12 = vector.shape_cast %11 : vector<4x8xf32> to vector<4x8x1xf32>
    %13 = vector.broadcast %12 : vector<4x8x1xf32> to vector<4x8x4xf32>
    %14 = arith.subf %10, %13 : vector<4x8x4xf32>
    %15 = math.exp %14 : vector<4x8x4xf32>
    %cst_6 = arith.constant dense<0.000000e+00> : vector<4x8xf32>
    %16 = vector.multi_reduction <add>, %15, %cst_6 [2] : vector<4x8x4xf32> to vector<4x8xf32>
    %17 = vector.shape_cast %16 : vector<4x8xf32> to vector<4x8x1xf32>
    %18 = tpu.reciprocal %17 {approx = true} : vector<4x8x1xf32> -> vector<4x8x1xf32>
    %19 = vector.broadcast %18 : vector<4x8x1xf32> to vector<4x8x4xf32>
    %20 = arith.mulf %15, %19 : vector<4x8x4xf32>
    %21 = vector.shape_cast %20 : vector<4x8x4xf32> to vector<4x8x4x1xf32>
    %22 = vector.shape_cast %7 : vector<32x32xf32> to vector<1x8x4x32xf32>
    %23 = vector.broadcast %21 : vector<4x8x4x1xf32> to vector<4x8x4x32xf32>
    %24 = vector.broadcast %22 : vector<1x8x4x32xf32> to vector<4x8x4x32xf32>
    %25 = arith.mulf %23, %24 : vector<4x8x4x32xf32>
    %26 = vector.shape_cast %0 : vector<32x32xf32> to vector<1x8x4x32xf32>
    %27 = vector.broadcast %26 : vector<1x8x4x32xf32> to vector<4x8x4x32xf32>
    %28 = arith.addf %25, %27 : vector<4x8x4x32xf32>
    %cst_7 = arith.constant dense<0.000000e+00> : vector<4x8x4xf32>
    %29 = vector.multi_reduction <add>, %28, %cst_7 [3] : vector<4x8x4x32xf32> to vector<4x8x4xf32>
    %30 = vector.shape_cast %29 : vector<4x8x4xf32> to vector<4x8x4x1xf32>
    %cst_8 = arith.constant 3.200000e+01 : f32
    %31 = vector.broadcast %cst_8 : f32 to vector<4x8x4x1xf32>
    %32 = arith.divf %30, %31 : vector<4x8x4x1xf32>
    %33 = vector.broadcast %32 : vector<4x8x4x1xf32> to vector<4x8x4x32xf32>
    %34 = arith.subf %28, %33 : vector<4x8x4x32xf32>
    %35 = arith.mulf %34, %34 : vector<4x8x4x32xf32>
    %cst_9 = arith.constant dense<0.000000e+00> : vector<4x8x4xf32>
    %36 = vector.multi_reduction <add>, %35, %cst_9 [3] : vector<4x8x4x32xf32> to vector<4x8x4xf32>
    %37 = vector.shape_cast %36 : vector<4x8x4xf32> to vector<4x8x4x1xf32>
    %cst_10 = arith.constant 3.200000e+01 : f32
    %38 = vector.broadcast %cst_10 : f32 to vector<4x8x4x1xf32>
    %39 = arith.divf %37, %38 : vector<4x8x4x1xf32>
    %40 = vector.broadcast %32 : vector<4x8x4x1xf32> to vector<4x8x4x32xf32>
    %41 = arith.subf %28, %40 : vector<4x8x4x32xf32>
    %cst_11 = arith.constant 9.99999974E-6 : f32
    %42 = vector.broadcast %cst_11 : f32 to vector<4x8x4x1xf32>
    %43 = arith.addf %39, %42 : vector<4x8x4x1xf32>
    %44 = math.rsqrt %43 : vector<4x8x4x1xf32>
    %45 = vector.broadcast %44 : vector<4x8x4x1xf32> to vector<4x8x4x32xf32>
    %46 = arith.mulf %41, %45 : vector<4x8x4x32xf32>
    %c0_12 = arith.constant 0 : index
    %c0_13 = arith.constant 0 : index
    %47 = vector.load %arg4[%c0_12, %c0_13] : memref<1x32xf32, #tpu.memory_space<vmem>>, vector<1x32xf32>
    %48 = vector.shape_cast %47 : vector<1x32xf32> to vector<1x1x1x32xf32>
    %49 = vector.broadcast %48 : vector<1x1x1x32xf32> to vector<4x8x4x32xf32>
    %50 = arith.mulf %46, %49 : vector<4x8x4x32xf32>
    %c0_14 = arith.constant 0 : index
    %c0_15 = arith.constant 0 : index
    %51 = vector.load %arg5[%c0_14, %c0_15] : memref<1x32xf32, #tpu.memory_space<vmem>>, vector<1x32xf32>
    %52 = vector.shape_cast %51 : vector<1x32xf32> to vector<1x1x1x32xf32>
    %53 = vector.broadcast %52 : vector<1x1x1x32xf32> to vector<4x8x4x32xf32>
    %54 = arith.addf %50, %53 : vector<4x8x4x32xf32>
    %55 = vector.shape_cast %54 : vector<4x8x4x32xf32> to vector<4x8x128xf32>
    %56 = arith.truncf %55 : vector<4x8x128xf32> to vector<4x8x128xbf16>
    %c0_16 = arith.constant 0 : index
    %c0_17 = arith.constant 0 : index
    %c0_18 = arith.constant 0 : index
    %57 = vector.load %arg6[%c0_16, %c0_17, %c0_18] : memref<4x8x128xbf16, #tpu.memory_space<vmem>>, vector<4x8x128xbf16>
    tpu.vector_store %arg6[%c0_16, %c0_17, %c0_18], %56 {strides = array<i32>} : memref<4x8x128xbf16, #tpu.memory_space<vmem>>, vector<4x8x128xbf16>,
    return
  }
  func.func @transform_0(%arg0: i32) -> (i32, i32) {
    %c0_i32 = arith.constant 0 : i32
    %c0_i32_0 = arith.constant 0 : i32
    return %arg0, %c0_i32 : i32, i32
  }
  func.func @transform_1(%arg0: i32) -> (i32, i32) {
    %c0_i32 = arith.constant 0 : i32
    %c0_i32_0 = arith.constant 0 : i32
    %c0_i32_1 = arith.constant 0 : i32
    return %c0_i32, %c0_i32_0 : i32, i32
  }
  func.func @transform_2(%arg0: i32) -> (i32, i32) {
    %c0_i32 = arith.constant 0 : i32
    %c0_i32_0 = arith.constant 0 : i32
    %c0_i32_1 = arith.constant 0 : i32
    return %c0_i32, %c0_i32_0 : i32, i32
  }
  func.func @transform_3(%arg0: i32) -> (i32, i32) {
    %c0_i32 = arith.constant 0 : i32
    %c0_i32_0 = arith.constant 0 : i32
    %c0_i32_1 = arith.constant 0 : i32
    return %c0_i32, %c0_i32_0 : i32, i32
  }
  func.func @transform_4(%arg0: i32) -> (i32, i32) {
    %c0_i32 = arith.constant 0 : i32
    %c0_i32_0 = arith.constant 0 : i32
    %c0_i32_1 = arith.constant 0 : i32
    return %c0_i32, %c0_i32_0 : i32, i32
  }
  func.func @transform_5(%arg0: i32) -> (i32, i32, i32) {
    %c0_i32 = arith.constant 0 : i32
    %c0_i32_0 = arith.constant 0 : i32
    %c0_i32_1 = arith.constant 0 : i32
    return %c0_i32, %arg0, %c0_i32_0 : i32, i32, i32
  }
}

</mosaic_0001>

<bundles_post_ra>
// kernel: tpu_custom_call.1
= control target key start
LH: loop header
LB: loop body
LE: loop exit
PB: predicated region body
PF: predicated region fallthrough
CT: control target
= control target key end

     0   :  { %10 = vsyncpa [#allocation3], 0  ;;  %s2560_s0 = inlined_call_operand.hbm [shape: f32[32,32], index: 0, kind: input, shape index: {}]   ;;  %s2561_s1 = inlined_call_operand.hbm [shape: bf16[32,36], index: 1, kind: input, shape index: {}]   ;;  %s2562_s2 = inlined_call_operand.vmem [shape: f32[1,36], index: 2, kind: input, shape index: {}]   ;;  %s2563_s3 = inlined_call_operand.vmem [shape: f32[1,32], index: 3, kind: input, shape index: {}]   ;;  %s2564_s4 = inlined_call_operand.vmem [shape: f32[1,32], index: 4, kind: input, shape index: {}]   ;;  %s2565_s5 = inlined_call_operand.hbm [shape: bf16[4,8,128], index: 5, kind: output, shape index: {}]  }
   0x1   :  { %11 = vsyncpa [#allocation6], 0 }
   0x2   :  { %12 = vsyncpa [#allocation4], 0  ;;  %s1719_s18 = smov [#allocation2]   ;;  %s1647_s22 = scalar_lea.hbm %s2560_s0, 512 }
   0x3   :  { %s18_s19 = sshll.u32 %s1719_s18, 4  ;;  %p1648_p0 = scmp.ne.s32.totalorder %s2560_s0, %s1647_s22  ;;  %s19_s19 = int_to_ptr.vmem [resolvable:$true] %s18_s19 }
   0x4   :  { %p1651_p1 = scmp.lt.u32.totalorder %s1647_s22, %s2560_s0 }
   0x6   :  { %p1653_p2 = pnand %p1651_p1, %p1648_p0 }
   0x8   :  { %1656 = shalt.err (!%p1653_p2)
}
   0x9   :  { %s1657_s27 = scalar_lea.vmem %s19_s19, 512  ;;  %p1662_p4 = scmp.lt.s32.totalorder %s19_s19, %s19_s19 }
   0xa   :  { %p1658_p3 = scmp.ne.s32.totalorder %s19_s19, %s1657_s27  ;;  %p1663_p5 = scmp.lt.s32.totalorder %s1657_s27, %s1657_s27 }
   0xc   :  { %p1664_p6 = por %p1663_p5, %p1662_p4 }
   0xe   :  { %p1665_p7 = pnand %p1664_p6, %p1658_p3 }
  0x10   :  { %1668 = shalt.err (!%p1665_p7)
}
  0x11   :  { %s1720_s28 = smov 128   ;;  %s1721_s29 = smov 8  }
  0x12   :  { %24 = dma.hbm_to_vmem [thread:$0]  %s2560_s0, 512, %s19_s19, [#allocation3], %s1720_s28, %s1720_s28, %s1721_s29  }
  0x13   :  { %s1722_s7 = smov [#allocation5]   ;;  %s1669_s11 = scalar_lea.hbm %s2561_s1, 256 }
  0x14   :  { %s30_s8 = sshll.u32 %s1722_s7, 4  ;;  %p1670_p8 = scmp.ne.s32.totalorder %s2561_s1, %s1669_s11  ;;  %s31_s8 = int_to_ptr.vmem [resolvable:$true] %s30_s8 }
  0x15   :  { %p1673_p9 = scmp.lt.u32.totalorder %s1669_s11, %s2561_s1 }
  0x17   :  { %p1675_p10 = pnand %p1673_p9, %p1670_p8 }
  0x19   :  { %1678 = shalt.err (!%p1675_p10)
}
  0x1a   :  { %s1679_s16 = scalar_lea.vmem %s31_s8, 256  ;;  %p1684_p12 = scmp.lt.s32.totalorder %s31_s8, %s31_s8 }
  0x1b   :  { %p1680_p11 = scmp.ne.s32.totalorder %s31_s8, %s1679_s16  ;;  %p1685_p13 = scmp.lt.s32.totalorder %s1679_s16, %s1679_s16 }
  0x1d   :  { %p1686_p0 = por %p1685_p13, %p1684_p12 }
  0x1f   :  { %p1687_p1 = pnand %p1686_p0, %p1680_p11 }
  0x21   :  { %1690 = shalt.err (!%p1687_p1)
}
  0x22   :  { %s1723_s0 = smov 64   ;;  %s1724_s17 = smov 4  }
  0x23   :  { %36 = dma.hbm_to_vmem [thread:$0]  %s2561_s1, 256, %s31_s8, [#allocation6], %s1723_s0, %s1723_s0, %s1724_s17  }
  0x24   :  { %1713 = dma.done.wait [#allocation3], 512  }
  0x25   :  { %1714 = vsyncadd [#allocation3], 4294966784 }
  0x26   :  { %1715 = dma.done.wait [#allocation6], 256  }
  0x27   :  { %1716 = vsyncadd [#allocation6], 4294967040  ;;  %v1561_v0 = vld [vmem:[#allocation5] sm:$0xff]   ;;  %v1562_v1 = vld [vmem:[#allocation5 + $0x8] sm:$0xff]   ;;  %vm79_vm0 = vcmask 261120   ;;  %s1725_s21 = smov 96   ;;  %v209_v28 = vlaneseq }
  0x28   :  { %1504 = vmatprep.subr.bf16.mxu0 %v1561_v0  ;;  %v1794_v2 = vld [vmem:[#allocation2] sm:$0xff]  ;;  %v1796_v3 = vld [vmem:[#allocation2 + $0x8] sm:$0xff]  ;;  %v1800_v5 = vld [vmem:[#allocation2 + $0x10] sm:$0xff]  ;;  %s1727_s22 = smov 120   ;;  %s1728_s23 = smov 116   ;;  %vm273_vm1 = vcmask 31744  }
  0x29   :  { %1505 = vmatpush3.bf16.msra.mxu0 %v1561_v0  ;;  %v54_v4 = vpack.c.bf16 %v1796_v3, %v1794_v2  ;;  %v1802_v6 = vld [vmem:[#allocation2 + $0x18] sm:$0xff]  ;;  %v1482_v8 = vld [vmem:[%s2562_s2] ss:$0 sm:$0xff]  ;;  %s1726_s2 = smov 124   ;;  %s1729_s24 = smov 112   ;;  %v1827_v31 = vshrl.u32 %v209_v28, 7 }
  0x2a   :  { %1506 = vmatprep.subr.bf16.mxu0 %v1562_v1  ;;  %v55_v7 = vpack.c.bf16 %v1802_v6, %v1800_v5  ;;  %s1730_s25 = smov 108   ;;  %s1731_s26 = smov 104   ;;  %v1733_v26 = vmov 1983009808   ;;  %v1734_v33 = vmov 1934713408  }
  0x2b   :  { %1508 = vmatprep.mubr.msk.bf16.mxu0 %vm79_vm0, %v54_v4  ;;  %s1732_s27 = smov 100   ;;  %v207_v27 = vunpack.c.l.s4 %v1733_v26  ;;  %v240_v34 = vunpack.c.l.s4 %v1734_v33  ;;  %vm626_vm2 = vcmask 257024   ;;  %vm1446_vm3 = vcmask 523264   ;;  %s1736_s6 = smov [#allocation7]  }
  0x2c   :  { %vm1451_vm4 = vcmask 785408   ;;  %s1469_s7 = sshll.u32 %s1736_s6, 4  ;;  %s1470_s7 = int_to_ptr.vmem [resolvable:$true] %s1469_s7 }
  0x2d   :  { %1507 = vmatpush3.bf16.msra.mxu0 %v1562_v1  ;;  %v208_v30 = vunpack.c.0.s8 %v207_v27  ;;  %v241_v40 = vunpack.c.0.s8 %v240_v34  ;;  %s1691_s8 = scalar_lea.vmem %s1470_s7, 256  ;;  %p1696_p3 = scmp.lt.s32.totalorder %s1470_s7, %s1470_s7 }
  0x2e   :  { %p1692_p2 = scmp.ne.s32.totalorder %s1470_s7, %s1691_s8  ;;  %p1697_p4 = scmp.lt.s32.totalorder %s1691_s8, %s1691_s8 }
  0x2f   :  { %v1830_v36 = vsub.s32 %v208_v30, %v1827_v31  ;;  %v1837_v47 = vsub.s32 %v241_v40, %v1827_v31  ;;  %v1858_v30 = vsub.s32 0, %v1827_v31 }
  0x30   :  { %1509 = vmatmul.mubr.msk.bf16.vlgmr.msra.gmra.mrb[0].mxu0 %vm79_vm0, %v55_v7  ;;  %p1698_p5 = por %p1697_p4, %p1696_p3 }
  0x32   :  { %p1699_p6 = pnand %p1698_p5, %p1692_p2 }
 0x103   :  { %v1510_v9 = vpop.f32.mrb[0].mxu0 }
 0x104   :  { %v1811_v10 = vadd.f32 %v1510_v9, %v1482_v8  ;;  %v120_v11 = vpop.f32.mrb[1].mxu0 }
 0x105   :  { %v1813_v12 = vadd.f32 %v1482_v8, %v120_v11  ;;  %v1511_v13 = vpop.f32.mrb[2].mxu0 }
 0x106   :  { %143 = vrot.lane.b32.xlu1 %v1811_v10, %s1725_s21  ;;  %v123_v14 = vpop.f32.mrb[3].mxu0  ;;  %v1819_v15 = vadd.f32 %v1511_v13, %v1482_v8 }
 0x107   :  { %139 = vrot.lane.b32.xlu0 %v1813_v12, %s1725_s21  ;;  %v1821_v16 = vadd.f32 %v1482_v8, %v123_v14 }
 0x10a   :  { %145 = vrot.lane.b32.xlu1 %v1819_v15, %s1725_s21 }
 0x10b   :  { %141 = vrot.lane.b32.xlu0 %v1821_v16, %s1725_s21 }
 0x178   :  { %v144_v19 = vpop.permute.xlu1 %143 }
 0x179   :  { %v140_v17 = vpop.permute.xlu0 %139 }
 0x17a   :  { %151 = vxpose.xlu0.b32.start [1/4] (short) (narrow) %v140_v17, 8 }
 0x17c   :  { %v146_v20 = vpop.permute.xlu1 %145 }
 0x17d   :  { %v142_v18 = vpop.permute.xlu0 %141 }
 0x17e   :  { %152 = vxpose.xlu0.b32.cont [2/4] (short) (narrow) %v142_v18, 8 }
 0x182   :  { %153 = vxpose.xlu0.b32.cont [3/4] (short) (narrow) %v144_v19, 8 }
 0x186   :  { %154 = vxpose.xlu0.b32.end [4/4] (short) (narrow) %v146_v20, 8 }
 0x1fa   :  { %v167_v21 = vpop.trf.xlu0 }
 0x1fb   :  { %184 = vrot.lane.b32.xlu1 %v167_v21, %s1726_s2 }
 0x1ff   :  { %187 = vrot.lane.b32.xlu1 %v167_v21, %s1727_s22 }
 0x203   :  { %190 = vrot.lane.b32.xlu1 %v167_v21, %s1728_s23 }
 0x207   :  { %193 = vrot.lane.b32.xlu1 %v167_v21, %s1729_s24 }
 0x20b   :  { %196 = vrot.lane.b32.xlu1 %v167_v21, %s1730_s25 }
 0x20f   :  { %199 = vrot.lane.b32.xlu1 %v167_v21, %s1731_s26 }
 0x213   :  { %202 = vrot.lane.b32.xlu1 %v167_v21, %s1732_s27 }
 0x26d   :  { %v185_v22 = vpop.permute.xlu1 %184 }
 0x271   :  { %v188_v23 = vpop.permute.xlu1 %187 }
 0x272   :  { %v205_v37 = vcombine.low %v167_v21, %v188_v23 }
 0x274   :  { %v212_v42 = vrot.slane %v205_v37, %v1830_v36  ;;  %v1863_v37 = vsub.s32 2, %v1827_v31 }
 0x275   :  { %v191_v24 = vpop.permute.xlu1 %190 }
 0x276   :  { %v213_v32 = vcombine.low %v185_v22, %v191_v24 }
 0x278   :  { %v220_v38 = vrot.slane %v213_v32, %v1830_v36 }
 0x279   :  { %v194_v25 = vpop.permute.xlu1 %193 }
 0x27a   :  { %v237_v44 = vcombine.low %v212_v42, %v220_v38  ;;  %v238_v48 = vcombine.high %v212_v42, %v220_v38  ;;  %v1866_v38 = vsub.s32 3, %v1827_v31  ;;  %v1874_v42 = vsub.s32 5, %v1827_v31 }
 0x27c   :  { %v245_v51 = vrot.slane %v237_v44, %v1837_v47  ;;  %v252_v56 = vrot.slane %v238_v48, %v1837_v47 }
 0x27d   :  { %v197_v29 = vpop.permute.xlu1 %196 }
 0x281   :  { %v200_v35 = vpop.permute.xlu1 %199 }
 0x282   :  { %v221_v39 = vcombine.low %v194_v25, %v200_v35 }
 0x284   :  { %v228_v45 = vrot.slane %v221_v39, %v1830_v36 }
 0x285   :  { %v203_v41 = vpop.permute.xlu1 %202 }
 0x286   :  { %v229_v43 = vcombine.low %v197_v29, %v203_v41  ;;  %v1855_v29 = vsub.s32 1, %v1827_v31  ;;  %v1871_v41 = vsub.s32 4, %v1827_v31 }
 0x288   :  { %v236_v46 = vrot.slane %v229_v43, %v1830_v36 }
 0x28a   :  { %v253_v49 = vcombine.low %v228_v45, %v236_v46  ;;  %v254_v50 = vcombine.high %v228_v45, %v236_v46  ;;  %v1879_v45 = vsub.s32 6, %v1827_v31  ;;  %v1882_v46 = vsub.s32 7, %v1827_v31 }
 0x28c   :  { %v261_v52 = vrot.slane %v253_v49, %v1837_v47  ;;  %v268_v53 = vrot.slane %v254_v50, %v1837_v47 }
 0x28e   :  { %v270_v54 = vcombine.high %v245_v51, %v261_v52  ;;  %v269_v55 = vcombine.low %v245_v51, %v261_v52  ;;  %v271_v59 = vcombine.low %v252_v56, %v268_v53  ;;  %v272_v61 = vcombine.high %v252_v56, %v268_v53 }
 0x290   :  { %v277_v57 = vsel %vm273_vm1, %v270_v54, -inf  ;;  %v274_v58 = vsel %vm273_vm1, %v269_v55, -inf  ;;  %v280_v60 = vsel %vm273_vm1, %v271_v59, -inf  ;;  %v283_v62 = vsel %vm273_vm1, %v272_v61, -inf }
 0x291   :  { %278 = vmax.xlane.f32.xlu0 %v277_v57  ;;  %275 = vmax.xlane.f32.xlu1 %v274_v58 }
 0x295   :  { %281 = vmax.xlane.f32.xlu1 %v280_v60 }
 0x299   :  { %284 = vmax.xlane.f32.xlu1 %v283_v62 }
 0x31e   :  { %v279_v63 = vpop.xlane.xlu0 %278  ;;  %v276_v0 = vpop.xlane.xlu1 %275 }
 0x31f   :  { %v287_v1 = vsub.f32 %v270_v54, %v279_v63  ;;  %v286_v4 = vsub.f32 %v269_v55, %v276_v0 }
 0x321   :  { %v290_v7 = vmul.f32 1.442695, %v286_v4  ;;  %v292_v8 = vmul.f32 1.442695, %v287_v1 }
 0x322   :  { %v282_v9 = vpop.xlane.xlu1 %281 }
 0x323   :  { %v288_v11 = vsub.f32 %v271_v59, %v282_v9  ;;  %1567 = vpow2.f32 %v290_v7 }
 0x324   :  { %1569 = vpow2.f32 %v292_v8 }
 0x325   :  { %v294_v13 = vmul.f32 1.442695, %v288_v11 }
 0x326   :  { %v285_v14 = vpop.xlane.xlu1 %284 }
 0x327   :  { %v289_v17 = vsub.f32 %v272_v61, %v285_v14  ;;  %1571 = vpow2.f32 %v294_v13 }
 0x329   :  { %v296_v18 = vmul.f32 1.442695, %v289_v17 }
 0x32b   :  { %1573 = vpow2.f32 %v296_v18 }
 0x32d   :  { %v1568_v19 = vpop.eup %1567 }
 0x32e   :  { %v298_v20 = vsel %vm273_vm1, %v1568_v19, 0.0  ;;  %v1570_v21 = vpop.eup %1569 }
 0x32f   :  { %299 = vadd.xlane.f32.xlu1 %v298_v20  ;;  %v301_v22 = vsel %vm273_vm1, %v1570_v21, 0.0 }
 0x331   :  { %v1572_v23 = vpop.eup %1571 }
 0x332   :  { %v304_v24 = vsel %vm273_vm1, %v1572_v23, 0.0 }
 0x333   :  { %302 = vadd.xlane.f32.xlu1 %v301_v22 }
 0x335   :  { %v1850_v25 = vpop.eup %1573 }
 0x336   :  { %v307_v26 = vsel %vm273_vm1, %v1850_v25, 0.0 }
 0x337   :  { %305 = vadd.xlane.f32.xlu1 %v304_v24 }
 0x33b   :  { %308 = vadd.xlane.f32.xlu1 %v307_v26  ;;  %v1917_v26 = vcombine.high %v1794_v2, %v1794_v2 }
 0x3bc   :  { %v300_v27 = vpop.xlane.xlu1 %299 }
 0x3bd   :  { %1575 = vrcp.f32 %v300_v27 }
 0x3c0   :  { %v303_v28 = vpop.xlane.xlu1 %302 }
 0x3c1   :  { %1577 = vrcp.f32 %v303_v28 }
 0x3c4   :  { %v306_v50 = vpop.xlane.xlu1 %305 }
 0x3c5   :  { %1579 = vrcp.f32 %v306_v50 }
 0x3c7   :  { %v1576_v32 = vpop.eup %1575 }
 0x3c8   :  { %v314_v33 = vmul.f32 %v1576_v32, %v1568_v19  ;;  %v309_v60 = vpop.xlane.xlu1 %308  ;;  %v1923_v32 = vcombine.high %v1821_v16, %v1821_v16 }
 0x3c9   :  { %1581 = vrcp.f32 %v309_v60 }
 0x3ca   :  { %v328_v34 = vrot.slane %v314_v33, %v1855_v29  ;;  %v321_v35 = vrot.slane %v314_v33, %v1858_v30  ;;  %v335_v39 = vrot.slane %v314_v33, %v1863_v37  ;;  %v342_v40 = vrot.slane %v314_v33, %v1866_v38 }
 0x3cb   :  { %v349_v43 = vrot.slane %v314_v33, %v1871_v41  ;;  %v356_v44 = vrot.slane %v314_v33, %v1874_v42  ;;  %v1578_v48 = vpop.eup %1577  ;;  %v363_v51 = vrot.slane %v314_v33, %v1879_v45  ;;  %v370_v52 = vrot.slane %v314_v33, %v1882_v46 }
 0x3cc   :  { %330 = vbcast.lane.b32.xlu1 %v328_v34, 256  ;;  %323 = vbcast.lane.b32.xlu0 %v321_v35, 256  ;;  %v315_v49 = vmul.f32 %v1578_v48, %v1570_v21  ;;  %v1933_v35 = vcombine.high %v1796_v3, %v1796_v3 }
 0x3ce   :  { %v384_v53 = vrot.slane %v315_v49, %v1855_v29  ;;  %v377_v54 = vrot.slane %v315_v49, %v1858_v30  ;;  %v398_v31 = vrot.slane %v315_v49, %v1866_v38  ;;  %v391_v55 = vrot.slane %v315_v49, %v1863_v37 }
 0x3cf   :  { %v412_v56 = vrot.slane %v315_v49, %v1874_v42  ;;  %v405_v57 = vrot.slane %v315_v49, %v1871_v41  ;;  %v1580_v58 = vpop.eup %1579  ;;  %v426_v61 = vrot.slane %v315_v49, %v1882_v46  ;;  %v419_v62 = vrot.slane %v315_v49, %v1879_v45 }
 0x3d0   :  { %337 = vbcast.lane.b32.xlu1 %v335_v39, 256  ;;  %344 = vbcast.lane.b32.xlu0 %v342_v40, 256  ;;  %v316_v59 = vmul.f32 %v1580_v58, %v1572_v23 }
 0x3d2   :  { %v440_v63 = vrot.slane %v316_v59, %v1855_v29  ;;  %v433_v0 = vrot.slane %v316_v59, %v1858_v30  ;;  %v454_v1 = vrot.slane %v316_v59, %v1866_v38  ;;  %v447_v4 = vrot.slane %v316_v59, %v1863_v37 }
 0x3d3   :  { %v468_v7 = vrot.slane %v316_v59, %v1874_v42  ;;  %v461_v8 = vrot.slane %v316_v59, %v1871_v41  ;;  %v1582_v9 = vpop.eup %1581  ;;  %v482_v13 = vrot.slane %v316_v59, %v1882_v46  ;;  %v475_v14 = vrot.slane %v316_v59, %v1879_v45 }
 0x3d4   :  { %351 = vbcast.lane.b32.xlu1 %v349_v43, 256  ;;  %358 = vbcast.lane.b32.xlu0 %v356_v44, 256  ;;  %v317_v11 = vmul.f32 %v1582_v9, %v1850_v25  ;;  %v1913_v25 = vcombine.high %v1813_v12, %v1813_v12  ;;  %v1943_v43 = vcombine.high %v1811_v10, %v1811_v10 }
 0x3d6   :  { %v496_v17 = vrot.slane %v317_v11, %v1855_v29  ;;  %v489_v18 = vrot.slane %v317_v11, %v1858_v30  ;;  %v510_v19 = vrot.slane %v317_v11, %v1866_v38  ;;  %v503_v20 = vrot.slane %v317_v11, %v1863_v37 }
 0x3d7   :  { %v524_v21 = vrot.slane %v317_v11, %v1874_v42  ;;  %v517_v22 = vrot.slane %v317_v11, %v1871_v41  ;;  %v538_v23 = vrot.slane %v317_v11, %v1882_v46  ;;  %v531_v24 = vrot.slane %v317_v11, %v1879_v45 }
 0x3d8   :  { %365 = vbcast.lane.b32.xlu1 %v363_v51, 256  ;;  %372 = vbcast.lane.b32.xlu0 %v370_v52, 256  ;;  %v1953_v46 = vcombine.high %v1800_v5, %v1800_v5 }
 0x3dc   :  { %386 = vbcast.lane.b32.xlu0 %v384_v53, 256  ;;  %379 = vbcast.lane.b32.xlu1 %v377_v54, 256  ;;  %v1963_v54 = vcombine.high %v1819_v15, %v1819_v15 }
 0x3e0   :  { %400 = vbcast.lane.b32.xlu0 %v398_v31, 256  ;;  %393 = vbcast.lane.b32.xlu1 %v391_v55, 256 }
 0x3e4   :  { %414 = vbcast.lane.b32.xlu0 %v412_v56, 256  ;;  %407 = vbcast.lane.b32.xlu1 %v405_v57, 256  ;;  %v1973_v56 = vcombine.high %v1802_v6, %v1802_v6 }
 0x3e8   :  { %428 = vbcast.lane.b32.xlu0 %v426_v61, 256  ;;  %421 = vbcast.lane.b32.xlu1 %v419_v62, 256 }
 0x3ec   :  { %442 = vbcast.lane.b32.xlu0 %v440_v63, 256  ;;  %435 = vbcast.lane.b32.xlu1 %v433_v0, 256 }
 0x3f0   :  { %456 = vbcast.lane.b32.xlu0 %v454_v1, 256  ;;  %449 = vbcast.lane.b32.xlu1 %v447_v4, 256 }
 0x3f4   :  { %470 = vbcast.lane.b32.xlu0 %v468_v7, 256  ;;  %463 = vbcast.lane.b32.xlu1 %v461_v8, 256 }
 0x3f8   :  { %484 = vbcast.lane.b32.xlu0 %v482_v13, 256  ;;  %477 = vbcast.lane.b32.xlu1 %v475_v14, 256 }
 0x3fc   :  { %498 = vbcast.lane.b32.xlu0 %v496_v17, 256  ;;  %491 = vbcast.lane.b32.xlu1 %v489_v18, 256 }
 0x400   :  { %512 = vbcast.lane.b32.xlu0 %v510_v19, 256  ;;  %505 = vbcast.lane.b32.xlu1 %v503_v20, 256 }
 0x404   :  { %526 = vbcast.lane.b32.xlu0 %v524_v21, 256  ;;  %519 = vbcast.lane.b32.xlu1 %v517_v22, 256 }
 0x408   :  { %540 = vbcast.lane.b32.xlu0 %v538_v23, 256  ;;  %533 = vbcast.lane.b32.xlu1 %v531_v24, 256 }
 0x43e   :  { %v324_v27 = vpop.permute.xlu0 %323  ;;  %v331_v28 = vpop.permute.xlu1 %330 }
 0x43f   :  { %v550_v29 = vmul.f32 %v324_v27, %v1813_v12  ;;  %v551_v30 = vmul.f32 %v1913_v25, %v331_v28 }
 0x441   :  { %v1926_v33 = vadd.f32 %v550_v29, %v1794_v2  ;;  %v1929_v34 = vadd.f32 %v1917_v26, %v551_v30 }
 0x442   :  { %v345_v37 = vpop.permute.xlu0 %344  ;;  %v338_v38 = vpop.permute.xlu1 %337 }
 0x443   :  { %v553_v39 = vmul.f32 %v1923_v32, %v345_v37  ;;  %v552_v40 = vmul.f32 %v338_v38, %v1821_v16  ;;  %v627_v41 = vsel %vm626_vm2, %v1926_v33, 0.0  ;;  %v630_v42 = vsel %vm626_vm2, %v1929_v34, 0.0 }
 0x444   :  { %628 = vadd.xlane.f32.xlu1 %v627_v41  ;;  %631 = vadd.xlane.f32.xlu0 %v630_v42 }
 0x445   :  { %v1946_v44 = vadd.f32 %v1933_v35, %v553_v39  ;;  %v1949_v45 = vadd.f32 %v552_v40, %v1796_v3 }
 0x446   :  { %v359_v48 = vpop.permute.xlu0 %358  ;;  %v352_v49 = vpop.permute.xlu1 %351 }
 0x447   :  { %v555_v50 = vmul.f32 %v1943_v43, %v359_v48  ;;  %v554_v51 = vmul.f32 %v352_v49, %v1811_v10  ;;  %v636_v52 = vsel %vm626_vm2, %v1946_v44, 0.0  ;;  %v633_v53 = vsel %vm626_vm2, %v1949_v45, 0.0 }
 0x448   :  { %637 = vadd.xlane.f32.xlu1 %v636_v52  ;;  %634 = vadd.xlane.f32.xlu0 %v633_v53 }
 0x449   :  { %v1966_v31 = vadd.f32 %v1953_v46, %v555_v50  ;;  %v1969_v55 = vadd.f32 %v554_v51, %v1800_v5 }
 0x44a   :  { %v373_v57 = vpop.permute.xlu0 %372  ;;  %v366_v58 = vpop.permute.xlu1 %365 }
 0x44b   :  { %v557_v59 = vmul.f32 %v1963_v54, %v373_v57  ;;  %v556_v60 = vmul.f32 %v366_v58, %v1819_v15  ;;  %v642_v61 = vsel %vm626_vm2, %v1966_v31, 0.0  ;;  %v639_v62 = vsel %vm626_vm2, %v1969_v55, 0.0 }
 0x44c   :  { %643 = vadd.xlane.f32.xlu1 %v642_v61  ;;  %640 = vadd.xlane.f32.xlu0 %v639_v62 }
 0x44d   :  { %v1982_v63 = vadd.f32 %v1973_v56, %v557_v59  ;;  %v1985_v0 = vadd.f32 %v556_v60, %v1802_v6 }
 0x44e   :  { %v387_v1 = vpop.permute.xlu0 %386  ;;  %v380_v4 = vpop.permute.xlu1 %379 }
 0x44f   :  { %v559_v7 = vmul.f32 %v1913_v25, %v387_v1  ;;  %v558_v8 = vmul.f32 %v380_v4, %v1813_v12  ;;  %v648_v9 = vsel %vm626_vm2, %v1982_v63, 0.0  ;;  %v645_v11 = vsel %vm626_vm2, %v1985_v0, 0.0 }
 0x450   :  { %649 = vadd.xlane.f32.xlu1 %v648_v9  ;;  %646 = vadd.xlane.f32.xlu0 %v645_v11 }
 0x451   :  { %v1994_v13 = vadd.f32 %v1917_v26, %v559_v7  ;;  %v1997_v14 = vadd.f32 %v558_v8, %v1794_v2 }
 0x452   :  { %v401_v17 = vpop.permute.xlu0 %400  ;;  %v394_v18 = vpop.permute.xlu1 %393 }
 0x453   :  { %v561_v19 = vmul.f32 %v1923_v32, %v401_v17  ;;  %v560_v20 = vmul.f32 %v394_v18, %v1821_v16  ;;  %v654_v21 = vsel %vm626_vm2, %v1994_v13, 0.0  ;;  %v651_v22 = vsel %vm626_vm2, %v1997_v14, 0.0 }
 0x454   :  { %655 = vadd.xlane.f32.xlu1 %v654_v21  ;;  %652 = vadd.xlane.f32.xlu0 %v651_v22 }
 0x455   :  { %v2006_v23 = vadd.f32 %v1933_v35, %v561_v19  ;;  %v2009_v24 = vadd.f32 %v560_v20, %v1796_v3 }
 0x456   :  { %v415_v27 = vpop.permute.xlu0 %414  ;;  %v408_v28 = vpop.permute.xlu1 %407 }
 0x457   :  { %v563_v29 = vmul.f32 %v1943_v43, %v415_v27  ;;  %v562_v30 = vmul.f32 %v408_v28, %v1811_v10  ;;  %v660_v37 = vsel %vm626_vm2, %v2006_v23, 0.0  ;;  %v657_v38 = vsel %vm626_vm2, %v2009_v24, 0.0 }
 0x458   :  { %661 = vadd.xlane.f32.xlu1 %v660_v37  ;;  %658 = vadd.xlane.f32.xlu0 %v657_v38 }
 0x459   :  { %v2018_v39 = vadd.f32 %v1953_v46, %v563_v29  ;;  %v2021_v40 = vadd.f32 %v562_v30, %v1800_v5 }
 0x45a   :  { %v429_v41 = vpop.permute.xlu0 %428  ;;  %v422_v42 = vpop.permute.xlu1 %421 }
 0x45b   :  { %v565_v48 = vmul.f32 %v1963_v54, %v429_v41  ;;  %v564_v49 = vmul.f32 %v422_v42, %v1819_v15  ;;  %v666_v50 = vsel %vm626_vm2, %v2018_v39, 0.0  ;;  %v663_v51 = vsel %vm626_vm2, %v2021_v40, 0.0 }
 0x45c   :  { %667 = vadd.xlane.f32.xlu1 %v666_v50  ;;  %664 = vadd.xlane.f32.xlu0 %v663_v51 }
 0x45d   :  { %v2030_v52 = vadd.f32 %v1973_v56, %v565_v48  ;;  %v2033_v53 = vadd.f32 %v564_v49, %v1802_v6 }
 0x45e   :  { %v443_v57 = vpop.permute.xlu0 %442  ;;  %v436_v58 = vpop.permute.xlu1 %435 }
 0x45f   :  { %v567_v59 = vmul.f32 %v1913_v25, %v443_v57  ;;  %v566_v60 = vmul.f32 %v436_v58, %v1813_v12  ;;  %v672_v61 = vsel %vm626_vm2, %v2030_v52, 0.0  ;;  %v669_v62 = vsel %vm626_vm2, %v2033_v53, 0.0 }
 0x460   :  { %673 = vadd.xlane.f32.xlu1 %v672_v61  ;;  %670 = vadd.xlane.f32.xlu0 %v669_v62 }
 0x461   :  { %v2042_v1 = vadd.f32 %v1917_v26, %v567_v59  ;;  %v2045_v4 = vadd.f32 %v566_v60, %v1794_v2 }
 0x462   :  { %v457_v7 = vpop.permute.xlu0 %456  ;;  %v450_v8 = vpop.permute.xlu1 %449 }
 0x463   :  { %v569_v9 = vmul.f32 %v1923_v32, %v457_v7  ;;  %v568_v11 = vmul.f32 %v450_v8, %v1821_v16  ;;  %v678_v17 = vsel %vm626_vm2, %v2042_v1, 0.0  ;;  %v675_v18 = vsel %vm626_vm2, %v2045_v4, 0.0 }
 0x464   :  { %679 = vadd.xlane.f32.xlu1 %v678_v17  ;;  %676 = vadd.xlane.f32.xlu0 %v675_v18 }
 0x465   :  { %v2054_v19 = vadd.f32 %v1933_v35, %v569_v9  ;;  %v2057_v20 = vadd.f32 %v568_v11, %v1796_v3 }
 0x466   :  { %v471_v21 = vpop.permute.xlu0 %470  ;;  %v464_v22 = vpop.permute.xlu1 %463 }
 0x467   :  { %v571_v27 = vmul.f32 %v1943_v43, %v471_v21  ;;  %v570_v28 = vmul.f32 %v464_v22, %v1811_v10  ;;  %v684_v29 = vsel %vm626_vm2, %v2054_v19, 0.0  ;;  %v681_v30 = vsel %vm626_vm2, %v2057_v20, 0.0 }
 0x468   :  { %685 = vadd.xlane.f32.xlu1 %v684_v29  ;;  %682 = vadd.xlane.f32.xlu0 %v681_v30 }
 0x469   :  { %v2066_v37 = vadd.f32 %v1953_v46, %v571_v27  ;;  %v2069_v38 = vadd.f32 %v570_v28, %v1800_v5 }
 0x46a   :  { %v485_v41 = vpop.permute.xlu0 %484  ;;  %v478_v42 = vpop.permute.xlu1 %477 }
 0x46b   :  { %v573_v48 = vmul.f32 %v1963_v54, %v485_v41  ;;  %v572_v49 = vmul.f32 %v478_v42, %v1819_v15  ;;  %v690_v50 = vsel %vm626_vm2, %v2066_v37, 0.0  ;;  %v687_v51 = vsel %vm626_vm2, %v2069_v38, 0.0 }
 0x46c   :  { %691 = vadd.xlane.f32.xlu1 %v690_v50  ;;  %688 = vadd.xlane.f32.xlu0 %v687_v51 }
 0x46d   :  { %v2078_v57 = vadd.f32 %v1973_v56, %v573_v48  ;;  %v2081_v58 = vadd.f32 %v572_v49, %v1802_v6 }
 0x46e   :  { %v499_v59 = vpop.permute.xlu0 %498  ;;  %v492_v60 = vpop.permute.xlu1 %491 }
 0x46f   :  { %v575_v61 = vmul.f32 %v1913_v25, %v499_v59  ;;  %v574_v62 = vmul.f32 %v492_v60, %v1813_v12  ;;  %v696_v7 = vsel %vm626_vm2, %v2078_v57, 0.0  ;;  %v693_v8 = vsel %vm626_vm2, %v2081_v58, 0.0 }
 0x470   :  { %697 = vadd.xlane.f32.xlu1 %v696_v7  ;;  %694 = vadd.xlane.f32.xlu0 %v693_v8 }
 0x471   :  { %v2090_v9 = vadd.f32 %v1917_v26, %v575_v61  ;;  %v2093_v11 = vadd.f32 %v574_v62, %v1794_v2 }
 0x472   :  { %v513_v17 = vpop.permute.xlu0 %512  ;;  %v506_v18 = vpop.permute.xlu1 %505 }
 0x473   :  { %v577_v25 = vmul.f32 %v1923_v32, %v513_v17  ;;  %v576_v12 = vmul.f32 %v506_v18, %v1821_v16  ;;  %v702_v21 = vsel %vm626_vm2, %v2090_v9, 0.0  ;;  %v699_v22 = vsel %vm626_vm2, %v2093_v11, 0.0 }
 0x474   :  { %703 = vadd.xlane.f32.xlu1 %v702_v21  ;;  %700 = vadd.xlane.f32.xlu0 %v699_v22 }
 0x475   :  { %v2102_v26 = vadd.f32 %v1933_v35, %v577_v25  ;;  %v2105_v2 = vadd.f32 %v576_v12, %v1796_v3 }
 0x476   :  { %v527_v27 = vpop.permute.xlu0 %526  ;;  %v520_v28 = vpop.permute.xlu1 %519 }
 0x477   :  { %v579_v32 = vmul.f32 %v1943_v43, %v527_v27  ;;  %v578_v16 = vmul.f32 %v520_v28, %v1811_v10  ;;  %v708_v29 = vsel %vm626_vm2, %v2102_v26, 0.0  ;;  %v705_v30 = vsel %vm626_vm2, %v2105_v2, 0.0 }
 0x478   :  { %709 = vadd.xlane.f32.xlu1 %v708_v29  ;;  %706 = vadd.xlane.f32.xlu0 %v705_v30 }
 0x479   :  { %v2114_v35 = vadd.f32 %v1953_v46, %v579_v32  ;;  %v2117_v3 = vadd.f32 %v578_v16, %v1800_v5 }
 0x47a   :  { %v541_v41 = vpop.permute.xlu0 %540  ;;  %v534_v42 = vpop.permute.xlu1 %533 }
 0x47b   :  { %v581_v43 = vmul.f32 %v1963_v54, %v541_v41  ;;  %v580_v10 = vmul.f32 %v534_v42, %v1819_v15  ;;  %v714_v48 = vsel %vm626_vm2, %v2114_v35, 0.0  ;;  %v711_v49 = vsel %vm626_vm2, %v2117_v3, 0.0 }
 0x47c   :  { %715 = vadd.xlane.f32.xlu1 %v714_v48  ;;  %712 = vadd.xlane.f32.xlu0 %v711_v49 }
 0x47d   :  { %v2126_v46 = vadd.f32 %v1973_v56, %v581_v43  ;;  %v2129_v5 = vadd.f32 %v580_v10, %v1802_v6 }
 0x47f   :  { %v720_v50 = vsel %vm626_vm2, %v2126_v46, 0.0  ;;  %v717_v15 = vsel %vm626_vm2, %v2129_v5, 0.0 }
 0x480   :  { %721 = vadd.xlane.f32.xlu1 %v720_v50  ;;  %718 = vadd.xlane.f32.xlu0 %v717_v15 }
 0x4d1   :  { %v629_v54 = vpop.xlane.xlu1 %628  ;;  %v632_v51 = vpop.xlane.xlu0 %631 }
 0x4d2   :  { %v724_v59 = vmul.f32 0.03125, %v629_v54  ;;  %v725_v60 = vmul.f32 0.03125, %v632_v51 }
 0x4d4   :  { %v2136_v61 = vsub.f32 %v1926_v33, %v724_v59  ;;  %v2139_v56 = vsub.f32 %v1929_v34, %v725_v60 }
 0x4d5   :  { %v638_v6 = vpop.xlane.xlu1 %637  ;;  %v635_v62 = vpop.xlane.xlu0 %634 }
 0x4d6   :  { %v727_v7 = vmul.f32 0.03125, %v638_v6  ;;  %v726_v8 = vmul.f32 0.03125, %v635_v62  ;;  %v788_v17 = vmul.f32 %v2136_v61, %v2136_v61  ;;  %v789_v18 = vmul.f32 %v2139_v56, %v2139_v56 }
 0x4d8   :  { %v2146_v25 = vsub.f32 %v1946_v44, %v727_v7  ;;  %v2149_v12 = vsub.f32 %v1949_v45, %v726_v8  ;;  %v820_v33 = vsel %vm626_vm2, %v788_v17, 0.0  ;;  %v823_v34 = vsel %vm626_vm2, %v789_v18, 0.0 }
 0x4d9   :  { %v644_v21 = vpop.xlane.xlu1 %643  ;;  %821 = vadd.xlane.f32.xlu0 %v820_v33  ;;  %824 = vadd.xlane.f32.xlu1 %v823_v34  ;;  %v641_v22 = vpop.xlane.xlu0 %640 }
 0x4da   :  { %v729_v27 = vmul.f32 0.03125, %v644_v21  ;;  %v728_v28 = vmul.f32 0.03125, %v641_v22  ;;  %v791_v32 = vmul.f32 %v2146_v25, %v2146_v25  ;;  %v790_v44 = vmul.f32 %v2149_v12, %v2149_v12 }
 0x4dc   :  { %v2158_v16 = vsub.f32 %v1966_v31, %v729_v27  ;;  %v2161_v45 = vsub.f32 %v1969_v55, %v728_v28  ;;  %v829_v29 = vsel %vm626_vm2, %v791_v32, 0.0  ;;  %v826_v30 = vsel %vm626_vm2, %v790_v44, 0.0 }
 0x4dd   :  { %v650_v41 = vpop.xlane.xlu1 %649  ;;  %830 = vadd.xlane.f32.xlu1 %v829_v29  ;;  %827 = vadd.xlane.f32.xlu0 %v826_v30  ;;  %v647_v42 = vpop.xlane.xlu0 %646 }
 0x4de   :  { %v731_v43 = vmul.f32 0.03125, %v650_v41  ;;  %v730_v10 = vmul.f32 0.03125, %v647_v42  ;;  %v793_v48 = vmul.f32 %v2158_v16, %v2158_v16  ;;  %v792_v31 = vmul.f32 %v2161_v45, %v2161_v45 }
 0x4e0   :  { %v2170_v49 = vsub.f32 %v1982_v63, %v731_v43  ;;  %v2173_v55 = vsub.f32 %v1985_v0, %v730_v10  ;;  %v835_v50 = vsel %vm626_vm2, %v793_v48, 0.0  ;;  %v832_v15 = vsel %vm626_vm2, %v792_v31, 0.0 }
 0x4e1   :  { %v656_v54 = vpop.xlane.xlu1 %655  ;;  %836 = vadd.xlane.f32.xlu1 %v835_v50  ;;  %833 = vadd.xlane.f32.xlu0 %v832_v15  ;;  %v653_v51 = vpop.xlane.xlu0 %652 }
 0x4e2   :  { %v733_v59 = vmul.f32 0.03125, %v656_v54  ;;  %v732_v60 = vmul.f32 0.03125, %v653_v51  ;;  %v795_v6 = vmul.f32 %v2170_v49, %v2170_v49  ;;  %v794_v63 = vmul.f32 %v2173_v55, %v2173_v55 }
 0x4e4   :  { %v2182_v62 = vsub.f32 %v1994_v13, %v733_v59  ;;  %v2185_v0 = vsub.f32 %v1997_v14, %v732_v60  ;;  %v841_v7 = vsel %vm626_vm2, %v795_v6, 0.0  ;;  %v838_v8 = vsel %vm626_vm2, %v794_v63, 0.0 }
 0x4e5   :  { %v662_v17 = vpop.xlane.xlu1 %661  ;;  %842 = vadd.xlane.f32.xlu1 %v841_v7  ;;  %839 = vadd.xlane.f32.xlu0 %v838_v8  ;;  %v659_v18 = vpop.xlane.xlu0 %658 }
 0x4e6   :  { %v735_v33 = vmul.f32 0.03125, %v662_v17  ;;  %v734_v34 = vmul.f32 0.03125, %v659_v18  ;;  %v797_v21 = vmul.f32 %v2182_v62, %v2182_v62  ;;  %v796_v13 = vmul.f32 %v2185_v0, %v2185_v0 }
 0x4e8   :  { %v2194_v22 = vsub.f32 %v2006_v23, %v735_v33  ;;  %v2197_v14 = vsub.f32 %v2009_v24, %v734_v34  ;;  %v847_v27 = vsel %vm626_vm2, %v797_v21, 0.0  ;;  %v844_v28 = vsel %vm626_vm2, %v796_v13, 0.0 }
 0x4e9   :  { %v668_v32 = vpop.xlane.xlu1 %667  ;;  %848 = vadd.xlane.f32.xlu1 %v847_v27  ;;  %845 = vadd.xlane.f32.xlu0 %v844_v28  ;;  %v665_v44 = vpop.xlane.xlu0 %664 }
 0x4ea   :  { %v737_v29 = vmul.f32 0.03125, %v668_v32  ;;  %v736_v30 = vmul.f32 0.03125, %v665_v44  ;;  %v799_v41 = vmul.f32 %v2194_v22, %v2194_v22  ;;  %v798_v23 = vmul.f32 %v2197_v14, %v2197_v14 }
 0x4ec   :  { %v2206_v42 = vsub.f32 %v2018_v39, %v737_v29  ;;  %v2209_v24 = vsub.f32 %v2021_v40, %v736_v30  ;;  %v853_v43 = vsel %vm626_vm2, %v799_v41, 0.0  ;;  %v850_v10 = vsel %vm626_vm2, %v798_v23, 0.0 }
 0x4ed   :  { %v674_v48 = vpop.xlane.xlu1 %673  ;;  %854 = vadd.xlane.f32.xlu1 %v853_v43  ;;  %851 = vadd.xlane.f32.xlu0 %v850_v10  ;;  %v671_v31 = vpop.xlane.xlu0 %670 }
 0x4ee   :  { %v739_v50 = vmul.f32 0.03125, %v674_v48  ;;  %v738_v15 = vmul.f32 0.03125, %v671_v31  ;;  %v801_v54 = vmul.f32 %v2206_v42, %v2206_v42  ;;  %v800_v39 = vmul.f32 %v2209_v24, %v2209_v24 }
 0x4f0   :  { %v2218_v51 = vsub.f32 %v2030_v52, %v739_v50  ;;  %v2221_v40 = vsub.f32 %v2033_v53, %v738_v15  ;;  %v859_v59 = vsel %vm626_vm2, %v801_v54, 0.0  ;;  %v856_v60 = vsel %vm626_vm2, %v800_v39, 0.0 }
 0x4f1   :  { %v680_v6 = vpop.xlane.xlu1 %679  ;;  %860 = vadd.xlane.f32.xlu1 %v859_v59  ;;  %857 = vadd.xlane.f32.xlu0 %v856_v60  ;;  %v677_v63 = vpop.xlane.xlu0 %676 }
 0x4f2   :  { %v741_v7 = vmul.f32 0.03125, %v680_v6  ;;  %v740_v8 = vmul.f32 0.03125, %v677_v63  ;;  %v803_v17 = vmul.f32 %v2218_v51, %v2218_v51  ;;  %v802_v52 = vmul.f32 %v2221_v40, %v2221_v40 }
 0x4f4   :  { %v2230_v18 = vsub.f32 %v2042_v1, %v741_v7  ;;  %v2233_v53 = vsub.f32 %v2045_v4, %v740_v8  ;;  %v865_v33 = vsel %vm626_vm2, %v803_v17, 0.0  ;;  %v862_v34 = vsel %vm626_vm2, %v802_v52, 0.0 }
 0x4f5   :  { %v686_v21 = vpop.xlane.xlu1 %685  ;;  %866 = vadd.xlane.f32.xlu1 %v865_v33  ;;  %863 = vadd.xlane.f32.xlu0 %v862_v34  ;;  %v683_v13 = vpop.xlane.xlu0 %682 }
 0x4f6   :  { %v743_v27 = vmul.f32 0.03125, %v686_v21  ;;  %v742_v28 = vmul.f32 0.03125, %v683_v13  ;;  %v805_v32 = vmul.f32 %v2230_v18, %v2230_v18  ;;  %v804_v1 = vmul.f32 %v2233_v53, %v2233_v53 }
 0x4f8   :  { %v2242_v44 = vsub.f32 %v2054_v19, %v743_v27  ;;  %v2245_v4 = vsub.f32 %v2057_v20, %v742_v28  ;;  %v871_v29 = vsel %vm626_vm2, %v805_v32, 0.0  ;;  %v868_v30 = vsel %vm626_vm2, %v804_v1, 0.0 }
 0x4f9   :  { %v692_v41 = vpop.xlane.xlu1 %691  ;;  %872 = vadd.xlane.f32.xlu1 %v871_v29  ;;  %869 = vadd.xlane.f32.xlu0 %v868_v30  ;;  %v689_v23 = vpop.xlane.xlu0 %688 }
 0x4fa   :  { %v745_v43 = vmul.f32 0.03125, %v692_v41  ;;  %v744_v10 = vmul.f32 0.03125, %v689_v23  ;;  %v807_v48 = vmul.f32 %v2242_v44, %v2242_v44  ;;  %v806_v19 = vmul.f32 %v2245_v4, %v2245_v4 }
 0x4fc   :  { %v2254_v31 = vsub.f32 %v2066_v37, %v745_v43  ;;  %v2257_v20 = vsub.f32 %v2069_v38, %v744_v10  ;;  %v877_v50 = vsel %vm626_vm2, %v807_v48, 0.0  ;;  %v874_v15 = vsel %vm626_vm2, %v806_v19, 0.0 }
 0x4fd   :  { %v698_v54 = vpop.xlane.xlu1 %697  ;;  %878 = vadd.xlane.f32.xlu1 %v877_v50  ;;  %875 = vadd.xlane.f32.xlu0 %v874_v15  ;;  %v695_v39 = vpop.xlane.xlu0 %694 }
 0x4fe   :  { %v747_v59 = vmul.f32 0.03125, %v698_v54  ;;  %v746_v60 = vmul.f32 0.03125, %v695_v39  ;;  %v809_v6 = vmul.f32 %v2254_v31, %v2254_v31  ;;  %v808_v37 = vmul.f32 %v2257_v20, %v2257_v20 }
 0x500   :  { %v2266_v63 = vsub.f32 %v2078_v57, %v747_v59  ;;  %v2269_v38 = vsub.f32 %v2081_v58, %v746_v60  ;;  %v883_v7 = vsel %vm626_vm2, %v809_v6, 0.0  ;;  %v880_v8 = vsel %vm626_vm2, %v808_v37, 0.0 }
 0x501   :  { %v704_v17 = vpop.xlane.xlu1 %703  ;;  %884 = vadd.xlane.f32.xlu1 %v883_v7  ;;  %881 = vadd.xlane.f32.xlu0 %v880_v8  ;;  %v701_v52 = vpop.xlane.xlu0 %700 }
 0x502   :  { %v749_v33 = vmul.f32 0.03125, %v704_v17  ;;  %v748_v34 = vmul.f32 0.03125, %v701_v52  ;;  %v811_v21 = vmul.f32 %v2266_v63, %v2266_v63  ;;  %v810_v57 = vmul.f32 %v2269_v38, %v2269_v38 }
 0x504   :  { %v2278_v13 = vsub.f32 %v2090_v9, %v749_v33  ;;  %v2281_v58 = vsub.f32 %v2093_v11, %v748_v34  ;;  %v889_v27 = vsel %vm626_vm2, %v811_v21, 0.0  ;;  %v886_v28 = vsel %vm626_vm2, %v810_v57, 0.0 }
 0x505   :  { %v710_v32 = vpop.xlane.xlu1 %709  ;;  %890 = vadd.xlane.f32.xlu1 %v889_v27  ;;  %887 = vadd.xlane.f32.xlu0 %v886_v28  ;;  %v707_v1 = vpop.xlane.xlu0 %706 }
 0x506   :  { %v751_v29 = vmul.f32 0.03125, %v710_v32  ;;  %v750_v30 = vmul.f32 0.03125, %v707_v1  ;;  %v813_v41 = vmul.f32 %v2278_v13, %v2278_v13  ;;  %v812_v9 = vmul.f32 %v2281_v58, %v2281_v58 }
 0x508   :  { %v2290_v23 = vsub.f32 %v2102_v26, %v751_v29  ;;  %v2293_v11 = vsub.f32 %v2105_v2, %v750_v30  ;;  %v895_v43 = vsel %vm626_vm2, %v813_v41, 0.0  ;;  %v892_v10 = vsel %vm626_vm2, %v812_v9, 0.0 }
 0x509   :  { %v716_v48 = vpop.xlane.xlu1 %715  ;;  %896 = vadd.xlane.f32.xlu1 %v895_v43  ;;  %893 = vadd.xlane.f32.xlu0 %v892_v10  ;;  %v713_v19 = vpop.xlane.xlu0 %712 }
 0x50a   :  { %v753_v50 = vmul.f32 0.03125, %v716_v48  ;;  %v752_v15 = vmul.f32 0.03125, %v713_v19  ;;  %v815_v54 = vmul.f32 %v2290_v23, %v2290_v23  ;;  %v814_v26 = vmul.f32 %v2293_v11, %v2293_v11 }
 0x50c   :  { %v2302_v39 = vsub.f32 %v2114_v35, %v753_v50  ;;  %v2305_v2 = vsub.f32 %v2117_v3, %v752_v15  ;;  %v901_v59 = vsel %vm626_vm2, %v815_v54, 0.0  ;;  %v898_v60 = vsel %vm626_vm2, %v814_v26, 0.0 }
 0x50d   :  { %v722_v6 = vpop.xlane.xlu1 %721  ;;  %902 = vadd.xlane.f32.xlu1 %v901_v59  ;;  %899 = vadd.xlane.f32.xlu0 %v898_v60  ;;  %v719_v37 = vpop.xlane.xlu0 %718 }
 0x50e   :  { %v755_v7 = vmul.f32 0.03125, %v722_v6  ;;  %v754_v8 = vmul.f32 0.03125, %v719_v37  ;;  %v817_v17 = vmul.f32 %v2302_v39, %v2302_v39  ;;  %v816_v35 = vmul.f32 %v2305_v2, %v2305_v2 }
 0x510   :  { %v2314_v52 = vsub.f32 %v2126_v46, %v755_v7  ;;  %v2317_v3 = vsub.f32 %v2129_v5, %v754_v8  ;;  %v907_v33 = vsel %vm626_vm2, %v817_v17, 0.0  ;;  %v904_v34 = vsel %vm626_vm2, %v816_v35, 0.0 }
 0x511   :  { %908 = vadd.xlane.f32.xlu1 %v907_v33  ;;  %905 = vadd.xlane.f32.xlu0 %v904_v34 }
 0x512   :  { %v819_v21 = vmul.f32 %v2314_v52, %v2314_v52  ;;  %v818_v57 = vmul.f32 %v2317_v3, %v2317_v3 }
 0x514   :  { %v913_v27 = vsel %vm626_vm2, %v819_v21, 0.0  ;;  %v910_v46 = vsel %vm626_vm2, %v818_v57, 0.0 }
 0x515   :  { %914 = vadd.xlane.f32.xlu1 %v913_v27  ;;  %911 = vadd.xlane.f32.xlu0 %v910_v46 }
 0x566   :  { %v825_v5 = vpop.xlane.xlu1 %824  ;;  %v822_v28 = vpop.xlane.xlu0 %821 }
 0x567   :  { %v917_v32 = vmul.f32 0.03125, %v825_v5  ;;  %v916_v29 = vmul.f32 0.03125, %v822_v28 }
 0x569   :  { %v949_v1 = vadd.f32 1e-05, %v917_v32  ;;  %v948_v19 = vadd.f32 1e-05, %v916_v29 }
 0x56a   :  { %v831_v30 = vpop.xlane.xlu1 %830  ;;  %v828_v41 = vpop.xlane.xlu0 %827 }
 0x56b   :  { %v919_v9 = vmul.f32 0.03125, %v831_v30  ;;  %v918_v43 = vmul.f32 0.03125, %v828_v41  ;;  %1583 = vrsqrt.f32 %v949_v1 }
 0x56d   :  { %v951_v10 = vadd.f32 1e-05, %v919_v9  ;;  %v950_v48 = vadd.f32 1e-05, %v918_v43 }
 0x56e   :  { %v837_v50 = vpop.xlane.xlu1 %836  ;;  %v834_v15 = vpop.xlane.xlu0 %833 }
 0x56f   :  { %1585 = vrsqrt.f32 %v951_v10  ;;  %v921_v54 = vmul.f32 0.03125, %v837_v50  ;;  %v920_v26 = vmul.f32 0.03125, %v834_v15 }
 0x570   :  { %1587 = vrsqrt.f32 %v950_v48  ;;  %v2332_v48 = vld [vmem:[%s2563_s3] ss:$0 sm:$0xff] }
 0x571   :  { %v953_v59 = vadd.f32 1e-05, %v921_v54  ;;  %v952_v60 = vadd.f32 1e-05, %v920_v26  ;;  %1589 = vrsqrt.f32 %v948_v19 }
 0x572   :  { %v843_v6 = vpop.xlane.xlu1 %842  ;;  %v840_v37 = vpop.xlane.xlu0 %839 }
 0x573   :  { %v923_v7 = vmul.f32 0.03125, %v843_v6  ;;  %v922_v8 = vmul.f32 0.03125, %v840_v37  ;;  %1591 = vrsqrt.f32 %v953_v59 }
 0x574   :  { %1593 = vrsqrt.f32 %v952_v60 }
 0x575   :  { %v955_v17 = vadd.f32 1e-05, %v923_v7  ;;  %v954_v35 = vadd.f32 1e-05, %v922_v8  ;;  %v1584_v27 = vpop.eup %1583 }
 0x576   :  { %v849_v33 = vpop.xlane.xlu1 %848  ;;  %v846_v34 = vpop.xlane.xlu0 %845  ;;  %v1013_v43 = vmul.f32 %v1584_v27, %v2139_v56 }
 0x577   :  { %1595 = vrsqrt.f32 %v955_v17  ;;  %v925_v21 = vmul.f32 0.03125, %v849_v33  ;;  %v924_v57 = vmul.f32 0.03125, %v846_v34 }
 0x578   :  { %1597 = vrsqrt.f32 %v954_v35  ;;  %v1052_v37 = vmul.f32 %v2332_v48, %v1013_v43 }
 0x579   :  { %v1586_v46 = vpop.eup %1585  ;;  %v957_v5 = vadd.f32 1e-05, %v925_v21  ;;  %v956_v28 = vadd.f32 1e-05, %v924_v57 }
 0x57a   :  { %v1588_v32 = vpop.eup %1587  ;;  %v1015_v1 = vmul.f32 %v1586_v46, %v2146_v25  ;;  %v855_v29 = vpop.xlane.xlu1 %854 }
 0x57b   :  { %v852_v30 = vpop.xlane.xlu0 %851  ;;  %1599 = vrsqrt.f32 %v957_v5  ;;  %v927_v41 = vmul.f32 0.03125, %v855_v29  ;;  %v1590_v9 = vpop.eup %1589  ;;  %v1014_v19 = vmul.f32 %v1588_v32, %v2149_v12  ;;  %v2341_v12 = vld [vmem:[%s2564_s4] ss:$0 sm:$0xff]  ;;  %s1735_s4 = smov 32  }
 0x57c   :  { %1601 = vrsqrt.f32 %v956_v28  ;;  %v926_v10 = vmul.f32 0.03125, %v852_v30  ;;  %v1054_v25 = vmul.f32 %v2332_v48, %v1015_v1  ;;  %v1012_v6 = vmul.f32 %v1590_v9, %v2136_v61 }
 0x57d   :  { %v959_v50 = vadd.f32 1e-05, %v927_v41  ;;  %v1592_v15 = vpop.eup %1591  ;;  %v1053_v17 = vmul.f32 %v2332_v48, %v1014_v19  ;;  %v1091_v29 = vadd.f32 %v2341_v12, %v1052_v37 }
 0x57e   :  { %v958_v54 = vadd.f32 1e-05, %v926_v10  ;;  %v861_v26 = vpop.xlane.xlu1 %860  ;;  %v1594_v60 = vpop.eup %1593  ;;  %v1017_v35 = vmul.f32 %v1592_v15, %v2158_v16  ;;  %v1093_v61 = vadd.f32 %v2341_v12, %v1054_v25  ;;  %v1051_v28 = vmul.f32 %v2332_v48, %v1012_v6 }
 0x57f   :  { %v858_v59 = vpop.xlane.xlu0 %857  ;;  %1603 = vrsqrt.f32 %v959_v50  ;;  %v929_v56 = vmul.f32 0.03125, %v861_v26  ;;  %v1016_v21 = vmul.f32 %v1594_v60, %v2161_v45  ;;  %v1092_v45 = vadd.f32 %v2341_v12, %v1053_v17 }
 0x580   :  { %1605 = vrsqrt.f32 %v958_v54  ;;  %v928_v7 = vmul.f32 0.03125, %v858_v59  ;;  %v1130_v25 = vcombine.low %v1091_v29, %v1093_v61  ;;  %v1090_v54 = vadd.f32 %v2341_v12, %v1051_v28 }
 0x581   :  { %v1596_v8 = vpop.eup %1595  ;;  %v961_v33 = vadd.f32 1e-05, %v929_v56  ;;  %v1055_v19 = vmul.f32 %v2332_v48, %v1016_v21 }
 0x582   :  { %v1598_v34 = vpop.eup %1597  ;;  %v1019_v57 = vmul.f32 %v1596_v8, %v2170_v49  ;;  %v960_v27 = vadd.f32 1e-05, %v928_v7  ;;  %v867_v46 = vpop.xlane.xlu1 %866  ;;  %v1056_v49 = vmul.f32 %v2332_v48, %v1017_v35  ;;  %v1122_v35 = vcombine.low %v1090_v54, %v1092_v45 }
 0x583   :  { %v864_v5 = vpop.xlane.xlu0 %863  ;;  %v1018_v32 = vmul.f32 %v1598_v34, %v2173_v55  ;;  %1607 = vrsqrt.f32 %v961_v33  ;;  %v931_v1 = vmul.f32 0.03125, %v867_v46  ;;  %v1094_v34 = vadd.f32 %v2341_v12, %v1055_v19 }
 0x584   :  { %v1058_v16 = vmul.f32 %v2332_v48, %v1019_v57  ;;  %1609 = vrsqrt.f32 %v960_v27  ;;  %v930_v30 = vmul.f32 0.03125, %v864_v5  ;;  %v1095_v7 = vadd.f32 %v2341_v12, %v1056_v49 }
 0x585   :  { %v1600_v41 = vpop.eup %1599  ;;  %v1057_v9 = vmul.f32 %v2332_v48, %v1018_v32  ;;  %v963_v43 = vadd.f32 1e-05, %v931_v1  ;;  %v2365_v27 = vrot.slane %v1130_v25, %v1830_v36  ;;  %v2375_v19 = vrot.slane %v1122_v35, %v1830_v36 }
 0x586   :  { %v1602_v10 = vpop.eup %1601  ;;  %v962_v55 = vadd.f32 1e-05, %v930_v30  ;;  %v873_v50 = vpop.xlane.xlu1 %872  ;;  %v1021_v26 = vmul.f32 %v1600_v41, %v2182_v62  ;;  %v1097_v60 = vadd.f32 %v2341_v12, %v1058_v16 }
 0x587   :  { %v870_v15 = vpop.xlane.xlu0 %869  ;;  %1611 = vrsqrt.f32 %v963_v43  ;;  %v933_v59 = vmul.f32 0.03125, %v873_v50  ;;  %v1020_v6 = vmul.f32 %v1602_v10, %v2185_v0  ;;  %v1096_v8 = vadd.f32 %v2341_v12, %v1057_v9 }
 0x588   :  { %1613 = vrsqrt.f32 %v962_v55  ;;  %v932_v56 = vmul.f32 0.03125, %v870_v15  ;;  %v1060_v0 = vmul.f32 %v2332_v48, %v1021_v26  ;;  %v1146_v29 = vcombine.low %v1095_v7, %v1097_v60 }
 0x589   :  { %v1604_v37 = vpop.eup %1603  ;;  %v965_v17 = vadd.f32 1e-05, %v933_v59  ;;  %v1059_v28 = vmul.f32 %v2332_v48, %v1020_v6  ;;  %v1138_v41 = vcombine.low %v1094_v34, %v1096_v8 }
 0x58a   :  { %v1606_v33 = vpop.eup %1605  ;;  %v1023_v62 = vmul.f32 %v1604_v37, %v2194_v22  ;;  %v964_v61 = vadd.f32 1e-05, %v932_v56  ;;  %v879_v21 = vpop.xlane.xlu1 %878  ;;  %v1099_v25 = vadd.f32 %v2341_v12, %v1060_v0  ;;  %v2386_v56 = vrot.slane %v1146_v29, %v1830_v36 }
 0x58b   :  { %v876_v57 = vpop.xlane.xlu0 %875  ;;  %v1022_v46 = vmul.f32 %v1606_v33, %v2197_v14  ;;  %1615 = vrsqrt.f32 %v965_v17  ;;  %v935_v5 = vmul.f32 0.03125, %v879_v21  ;;  %v1098_v54 = vadd.f32 %v2341_v12, %v1059_v28 }
 0x58c   :  { %v1062_v32 = vmul.f32 %v2332_v48, %v1023_v62  ;;  %v934_v1 = vmul.f32 0.03125, %v876_v57  ;;  %1617 = vrsqrt.f32 %v964_v61  ;;  %v2383_v6 = vrot.slane %v1138_v41, %v1830_v36 }
 0x58d   :  { %v1608_v16 = vpop.eup %1607  ;;  %v1061_v22 = vmul.f32 %v2332_v48, %v1022_v46  ;;  %v967_v30 = vadd.f32 1e-05, %v935_v5  ;;  %v1154_v0 = vcombine.low %v2375_v19, %v2365_v27 }
 0x58e   :  { %v1610_v45 = vpop.eup %1609  ;;  %v1101_v49 = vadd.f32 %v2341_v12, %v1062_v32  ;;  %v1025_v9 = vmul.f32 %v1608_v16, %v2206_v42  ;;  %v966_v14 = vadd.f32 1e-05, %v934_v1  ;;  %v885_v43 = vpop.xlane.xlu1 %884  ;;  %v1170_v32 = vcombine.low %v2383_v6, %v2386_v56 }
 0x58f   :  { %v882_v10 = vpop.xlane.xlu0 %881  ;;  %v1100_v55 = vadd.f32 %v2341_v12, %v1061_v22  ;;  %v1024_v50 = vmul.f32 %v1610_v45, %v2209_v24  ;;  %1619 = vrsqrt.f32 %v967_v30  ;;  %v937_v15 = vmul.f32 0.03125, %v885_v43 }
 0x590   :  { %1621 = vrsqrt.f32 %v966_v14  ;;  %v936_v26 = vmul.f32 0.03125, %v882_v10  ;;  %v1064_v42 = vmul.f32 %v2332_v48, %v1025_v9  ;;  %v1198_v61 = vcombine.low %v1099_v25, %v1101_v49 }
 0x591   :  { %v1612_v59 = vpop.eup %1611  ;;  %v969_v60 = vadd.f32 1e-05, %v937_v15  ;;  %v1063_v24 = vmul.f32 %v2332_v48, %v1024_v50  ;;  %v1190_v33 = vcombine.low %v1098_v54, %v1100_v55  ;;  %v2409_v15 = vrot.slane %v1154_v0, %v1837_v47 }
 0x592   :  { %v1614_v37 = vpop.eup %1613  ;;  %v1027_v7 = vmul.f32 %v1612_v59, %v2218_v51  ;;  %v968_v8 = vadd.f32 1e-05, %v936_v26  ;;  %v891_v17 = vpop.xlane.xlu1 %890  ;;  %v1103_v5 = vadd.f32 %v2341_v12, %v1064_v42  ;;  %v2405_v9 = vrot.slane %v1198_v61, %v1830_v36 }
 0x593   :  { %v888_v35 = vpop.xlane.xlu0 %887  ;;  %v1026_v34 = vmul.f32 %v1614_v37, %v2221_v40  ;;  %1623 = vrsqrt.f32 %v969_v60  ;;  %v939_v62 = vmul.f32 0.03125, %v891_v17  ;;  %v1102_v40 = vadd.f32 %v2341_v12, %v1063_v24 }
 0x594   :  { %v1066_v21 = vmul.f32 %v2332_v48, %v1027_v7  ;;  %1625 = vrsqrt.f32 %v968_v8  ;;  %v938_v57 = vmul.f32 0.03125, %v888_v35  ;;  %v2401_v30 = vrot.slane %v1190_v33, %v1830_v36 }
 0x595   :  { %v1616_v46 = vpop.eup %1615  ;;  %v1065_v51 = vmul.f32 %v2332_v48, %v1026_v34  ;;  %v971_v28 = vadd.f32 1e-05, %v939_v62  ;;  %v2412_v25 = vrot.slane %v1170_v32, %v1837_v47 }
 0x596   :  { %v1105_v1 = vadd.f32 %v2341_v12, %v1066_v21  ;;  %v970_v29 = vadd.f32 1e-05, %v938_v57  ;;  %v897_v16 = vpop.xlane.xlu1 %896  ;;  %v1618_v41 = vpop.eup %1617  ;;  %v1029_v14 = vmul.f32 %v1616_v46, %v2230_v18 }
 0x597   :  { %v894_v22 = vpop.xlane.xlu0 %893  ;;  %v1104_v45 = vadd.f32 %v2341_v12, %v1065_v51  ;;  %1627 = vrsqrt.f32 %v971_v28  ;;  %v941_v49 = vmul.f32 0.03125, %v897_v16  ;;  %v1028_v59 = vmul.f32 %v1618_v41, %v2233_v53 }
 0x598   :  { %1629 = vrsqrt.f32 %v970_v29  ;;  %v940_v43 = vmul.f32 0.03125, %v894_v22  ;;  %v1214_v10 = vcombine.low %v1103_v5, %v1105_v1  ;;  %v1068_v35 = vmul.f32 %v2332_v48, %v1029_v14 }
 0x599   :  { %v1620_v55 = vpop.eup %1619  ;;  %v973_v50 = vadd.f32 1e-05, %v941_v49  ;;  %v1206_v54 = vcombine.low %v1102_v40, %v1104_v45  ;;  %v1222_v53 = vcombine.low %v2401_v30, %v2405_v9  ;;  %v1067_v57 = vmul.f32 %v2332_v48, %v1028_v59 }
 0x59a   :  { %v1622_v26 = vpop.eup %1621  ;;  %v1031_v42 = vmul.f32 %v1620_v55, %v2242_v44  ;;  %v972_v60 = vadd.f32 1e-05, %v940_v43  ;;  %v903_v37 = vpop.xlane.xlu1 %902  ;;  %v2417_v24 = vrot.slane %v1214_v10, %v1830_v36  ;;  %v1107_v22 = vadd.f32 %v2341_v12, %v1068_v35 }
 0x59b   :  { %v900_v18 = vpop.xlane.xlu0 %899  ;;  %v1030_v7 = vmul.f32 %v1622_v26, %v2245_v4  ;;  %1631 = vrsqrt.f32 %v973_v50  ;;  %v943_v8 = vmul.f32 0.03125, %v903_v37  ;;  %v2422_v33 = vrot.slane %v1206_v54, %v1830_v36 }
 0x59c   :  { %v942_v17 = vmul.f32 0.03125, %v900_v18  ;;  %1633 = vrsqrt.f32 %v972_v60  ;;  %v1070_v34 = vmul.f32 %v2332_v48, %v1031_v42  ;;  %v1187_v4 = vcombine.high %v2409_v15, %v2412_v25 }
 0x59d   :  { %v1624_v44 = vpop.eup %1623  ;;  %v975_v62 = vadd.f32 1e-05, %v943_v8  ;;  %v1069_v0 = vmul.f32 %v2332_v48, %v1030_v7  ;;  %v1238_v28 = vcombine.low %v2422_v33, %v2417_v24  ;;  %v2436_v29 = vrot.slane %v1222_v53, %v1837_v47 }
 0x59e   :  { %v974_v61 = vadd.f32 1e-05, %v942_v17  ;;  %v1626_v21 = vpop.eup %1625  ;;  %v1033_v46 = vmul.f32 %v1624_v44, %v2254_v31  ;;  %v909_v5 = vpop.xlane.xlu1 %908  ;;  %v1109_v14 = vadd.f32 %v2341_v12, %v1070_v34  ;;  %v1106_v7 = vadd.f32 %v2341_v12, %v1067_v57 }
 0x59f   :  { %v906_v51 = vpop.xlane.xlu0 %905  ;;  %v1032_v32 = vmul.f32 %v1626_v21, %v2257_v20  ;;  %1635 = vrsqrt.f32 %v975_v62  ;;  %v945_v40 = vmul.f32 0.03125, %v909_v5  ;;  %v2439_v16 = vrot.slane %v1238_v28, %v1837_v47 }
 0x5a0   :  { %v944_v1 = vmul.f32 0.03125, %v906_v51  ;;  %1637 = vrsqrt.f32 %v974_v61  ;;  %v1072_v41 = vmul.f32 %v2332_v48, %v1033_v46  ;;  %v1108_v26 = vadd.f32 %v2341_v12, %v1069_v0 }
 0x5a1   :  { %v1628_v31 = vpop.eup %1627  ;;  %v977_v45 = vadd.f32 1e-05, %v945_v40  ;;  %v1071_v43 = vmul.f32 %v2332_v48, %v1032_v32  ;;  %v1255_v54 = vcombine.high %v2436_v29, %v2439_v16  ;;  %v1266_v62 = vcombine.low %v1107_v22, %v1109_v14 }
 0x5a2   :  { %v976_v49 = vadd.f32 1e-05, %v944_v1  ;;  %v1630_v20 = vpop.eup %1629  ;;  %v1035_v10 = vmul.f32 %v1628_v31, %v2266_v63  ;;  %v915_v55 = vpop.xlane.xlu1 %914  ;;  %v1258_v34 = vcombine.low %v1106_v7, %v1108_v26 }
 0x5a3   :  { %v912_v50 = vpop.xlane.xlu0 %911  ;;  %v1034_v59 = vmul.f32 %v1630_v20, %v2269_v38  ;;  %1639 = vrsqrt.f32 %v977_v45  ;;  %v947_v42 = vmul.f32 0.03125, %v915_v55  ;;  %v1531_v18 = vpack.i.bf16 %v1255_v54, %v1187_v4 }
 0x5a4   :  { %v946_v60 = vmul.f32 0.03125, %v912_v50  ;;  %v1074_v37 = vmul.f32 %v2332_v48, %v1035_v10  ;;  %1641 = vrsqrt.f32 %v976_v49  ;;  %v1111_v38 = vadd.f32 %v2341_v12, %v1072_v41 }
 0x5a5   :  { %v1632_v8 = vpop.eup %1631  ;;  %v1073_v63 = vmul.f32 %v2332_v48, %v1034_v59  ;;  %v979_v17 = vadd.f32 1e-05, %v947_v42  ;;  %1532 = vrot.lane.b32.xlu0 %v1531_v18, %s1735_s4  ;;  %v1110_v61 = vadd.f32 %v2341_v12, %v1071_v43  ;;  %v1265_v32 = vrot.slane %v1258_v34, %v1830_v36 }
 0x5a6   :  { %v978_v35 = vadd.f32 1e-05, %v946_v60  ;;  %v1634_v53 = vpop.eup %1633  ;;  %v1113_v44 = vadd.f32 %v2341_v12, %v1074_v37  ;;  %v1037_v21 = vmul.f32 %v1632_v8, %v2278_v13  ;;  %v1273_v40 = vrot.slane %v1266_v62, %v1830_v36 }
 0x5a7   :  { %1643 = vrsqrt.f32 %v979_v17  ;;  %v1112_v4 = vadd.f32 %v2341_v12, %v1073_v63  ;;  %v1036_v46 = vmul.f32 %v1634_v53, %v2281_v58  ;;  %v1186_v58 = vcombine.low %v2409_v15, %v2412_v25 }
 0x5a8   :  { %1645 = vrsqrt.f32 %v978_v35  ;;  %v1282_v57 = vcombine.low %v1111_v38, %v1113_v44  ;;  %v1076_v13 = vmul.f32 %v2332_v48, %v1037_v21  ;;  %v1254_v20 = vcombine.low %v2436_v29, %v2439_v16 }
 0x5a9   :  { %v1636_v0 = vpop.eup %1635  ;;  %v1274_v5 = vcombine.low %v1110_v61, %v1112_v4  ;;  %v1290_v10 = vcombine.low %v1265_v32, %v1273_v40 }
 0x5aa   :  { %v1638_v51 = vpop.eup %1637  ;;  %v1039_v28 = vmul.f32 %v1636_v0, %v2290_v23  ;;  %v1289_v1 = vrot.slane %v1282_v57, %v1830_v36  ;;  %v1075_v23 = vmul.f32 %v2332_v48, %v1036_v46  ;;  %v1115_v60 = vadd.f32 %v2341_v12, %v1076_v13 }
 0x5ab   :  { %v1038_v22 = vmul.f32 %v1638_v51, %v2293_v11  ;;  %v1281_v31 = vrot.slane %v1274_v5, %v1830_v36  ;;  %v2486_v7 = vrot.slane %v1290_v10, %v1837_v47  ;;  %v1291_v0 = vcombine.high %v1265_v32, %v1273_v40 }
 0x5ac   :  { %v1078_v41 = vmul.f32 %v2332_v48, %v1039_v28  ;;  %v1114_v42 = vadd.f32 %v2341_v12, %v1075_v23  ;;  %v1155_v40 = vcombine.high %v2375_v19, %v2365_v27 }
 0x5ad   :  { %v1640_v45 = vpop.eup %1639  ;;  %v1077_v49 = vmul.f32 %v2332_v48, %v1038_v22  ;;  %v1306_v14 = vcombine.low %v1281_v31, %v1289_v1  ;;  %v1307_v4 = vcombine.high %v1281_v31, %v1289_v1  ;;  %v1223_v1 = vcombine.high %v2401_v30, %v2405_v9 }
 0x5ae   :  { %v1642_v43 = vpop.eup %1641  ;;  %v1041_v11 = vmul.f32 %v1640_v45, %v2302_v39  ;;  %v1117_v54 = vadd.f32 %v2341_v12, %v1078_v41  ;;  %v1305_v32 = vrot.slane %v1291_v0, %v1837_v47 }
 0x5af   :  { %v1040_v55 = vmul.f32 %v1642_v43, %v2305_v2  ;;  %v1116_v50 = vadd.f32 %v2341_v12, %v1077_v49  ;;  %v2479_v26 = vrot.slane %v1306_v14, %v1837_v47  ;;  %v1321_v22 = vrot.slane %v1307_v4, %v1837_v47 }
 0x5b0   :  { %v1080_v18 = vmul.f32 %v2332_v48, %v1041_v11  ;;  %v1334_v17 = vcombine.low %v1115_v60, %v1117_v54  ;;  %v1237_v9 = vrot.slane %v1223_v1, %v1837_v47  ;;  %v1169_v49 = vrot.slane %v1155_v40, %v1837_v47 }
 0x5b1   :  { %v1644_v59 = vpop.eup %1643  ;;  %v1079_v2 = vmul.f32 %v2332_v48, %v1040_v55  ;;  %v1326_v63 = vcombine.low %v1114_v42, %v1116_v50  ;;  %v1322_v53 = vcombine.low %v2486_v7, %v2479_v26  ;;  %v1323_v23 = vcombine.high %v2486_v7, %v2479_v26 }
 0x5b2   :  { %v1646_v37 = vpop.eup %1645  ;;  %v1043_v39 = vmul.f32 %v1644_v59, %v2314_v52  ;;  %v1119_v44 = vadd.f32 %v2341_v12, %v1080_v18  ;;  %v1325_v55 = vcombine.high %v1305_v32, %v1321_v22 }
 0x5b3   :  { %v1042_v8 = vmul.f32 %v1646_v37, %v2317_v3  ;;  %v1118_v34 = vadd.f32 %v2341_v12, %v1079_v2  ;;  %v1333_v61 = vrot.slane %v1326_v63, %v1830_v36  ;;  %v1341_v3 = vrot.slane %v1334_v17, %v1830_v36 }
 0x5b4   :  { %v1082_v35 = vmul.f32 %v2332_v48, %v1043_v39 }
 0x5b5   :  { %v1081_v38 = vmul.f32 %v2332_v48, %v1042_v8  ;;  %v1239_v48 = vcombine.high %v2422_v33, %v2417_v24  ;;  %v1359_v51 = vcombine.high %v1333_v61, %v1341_v3  ;;  %v1358_v28 = vcombine.low %v1333_v61, %v1341_v3 }
 0x5b6   :  { %v1121_v52 = vadd.f32 %v2341_v12, %v1082_v35 }
 0x5b7   :  { %v1120_v62 = vadd.f32 %v2341_v12, %v1081_v38  ;;  %v1171_v12 = vcombine.high %v2383_v6, %v2386_v56  ;;  %v1253_v24 = vrot.slane %v1239_v48, %v1837_v47  ;;  %v1366_v41 = vrot.slane %v1358_v28, %v1837_v47 }
 0x5b8   :  { %v1350_v21 = vcombine.low %v1119_v44, %v1121_v52  ;;  %v1324_v56 = vcombine.low %v1305_v32, %v1321_v22 }
 0x5b9   :  { %v1342_v57 = vcombine.low %v1118_v34, %v1120_v62  ;;  %v1185_v30 = vrot.slane %v1171_v12, %v1837_v47  ;;  %v1256_v10 = vcombine.low %v1237_v9, %v1253_v24  ;;  %v1257_v42 = vcombine.high %v1237_v9, %v1253_v24 }
 0x5ba   :  { %v1357_v46 = vrot.slane %v1350_v21, %v1830_v36 }
 0x5bb   :  { %v1349_v5 = vrot.slane %v1342_v57, %v1830_v36  ;;  %v1373_v36 = vrot.slane %v1359_v51, %v1837_v47  ;;  %v1188_v50 = vcombine.low %v1169_v49, %v1185_v30  ;;  %v1189_v26 = vcombine.high %v1169_v49, %v1185_v30 }
 0x5bd   :  { %v1375_v31 = vcombine.high %v1349_v5, %v1357_v46  ;;  %v1374_v13 = vcombine.low %v1349_v5, %v1357_v46  ;;  %v1541_v59 = vpack.i.bf16 %v1256_v10, %v1188_v50  ;;  %v1551_v60 = vpack.i.bf16 %v1257_v42, %v1189_v26 }
 0x5bf   :  { %v1389_v33 = vrot.slane %v1375_v31, %v1837_v47  ;;  %v1382_v6 = vrot.slane %v1374_v13, %v1837_v47 }
 0x5c1   :  { %v1392_v45 = vcombine.low %v1373_v36, %v1389_v33  ;;  %v1391_v27 = vcombine.high %v1366_v41, %v1382_v6  ;;  %v1390_v19 = vcombine.low %v1366_v41, %v1382_v6  ;;  %v1393_v11 = vcombine.high %v1373_v36, %v1389_v33 }
 0x5c3   :  { %v1546_v14 = vpack.i.bf16 %v1392_v45, %v1324_v56  ;;  %v1536_v43 = vpack.i.bf16 %v1391_v27, %v1323_v23  ;;  %v1556_v54 = vpack.i.bf16 %v1393_v11, %v1325_v55 }
 0x5c5   :  { %1547 = vrot.lane.b32.xlu0 %v1546_v14, %s1723_s0  ;;  %1537 = vrot.lane.b32.xlu1 %v1536_v43, %s1735_s4 }
 0x5c9   :  { %1557 = vrot.lane.b32.xlu0 %v1556_v54, %s1725_s21  ;;  %1542 = vrot.lane.b32.xlu1 %v1541_v59, %s1723_s0 }
 0x5cd   :  { %1552 = vrot.lane.b32.xlu1 %v1551_v60, %s1725_s21 }
 0x617   :  { %v1533_v47 = vpop.permute.xlu0 %1532 }
 0x618   :  { %v1535_v44 = vunpack.i.h.bf16 %v1533_v47  ;;  %v1534_v52 = vunpack.i.l.bf16 %v1533_v47 }
 0x61a   :  { %v1443_v48 = vsel %vm79_vm0, %v1254_v20, %v1535_v44  ;;  %v1442_v5 = vsel %vm79_vm0, %v1186_v58, %v1534_v52 }
 0x637   :  { %v1538_v37 = vpop.permute.xlu1 %1537  ;;  %v1548_v18 = vpop.permute.xlu0 %1547 }
 0x638   :  { %v1540_v39 = vunpack.i.h.bf16 %v1538_v37  ;;  %v1539_v7 = vunpack.i.l.bf16 %v1538_v37  ;;  %v1550_v2 = vunpack.i.h.bf16 %v1548_v18  ;;  %v1549_v8 = vunpack.i.l.bf16 %v1548_v18 }
 0x63a   :  { %v1444_v63 = vsel %vm79_vm0, %v1322_v53, %v1539_v7  ;;  %v1445_v17 = vsel %vm79_vm0, %v1390_v19, %v1540_v39 }
 0x63b   :  { %v1543_v35 = vpop.permute.xlu1 %1542  ;;  %v1558_v38 = vpop.permute.xlu0 %1557  ;;  %v1450_v61 = vsel %vm1446_vm3, %v1445_v17, %v1550_v2  ;;  %v1449_v3 = vsel %vm1446_vm3, %v1444_v63, %v1549_v8 }
 0x63c   :  { %v1560_v34 = vunpack.i.h.bf16 %v1558_v38  ;;  %v1559_v62 = vunpack.i.l.bf16 %v1558_v38  ;;  %v1545_v4 = vunpack.i.h.bf16 %v1543_v35  ;;  %v1544_v21 = vunpack.i.l.bf16 %v1543_v35 }
 0x63e   :  { %v1454_v57 = vsel %vm1451_vm4, %v1449_v3, %v1559_v62  ;;  %v1455_v53 = vsel %vm1451_vm4, %v1450_v61, %v1560_v34  ;;  %v1447_v22 = vsel %vm1446_vm3, %v1442_v5, %v1544_v21  ;;  %v1448_v12 = vsel %vm1446_vm3, %v1443_v48, %v1545_v4 }
 0x63f   :  { %v1553_v0 = vpop.permute.xlu1 %1552  ;;  %v1497_v46 = vpack.c.bf16 %v1455_v53, %v1454_v57 }
 0x640   :  { %v1555_v51 = vunpack.i.h.bf16 %v1553_v0  ;;  %v1554_v28 = vunpack.i.l.bf16 %v1553_v0 }
 0x641   :  { %1499 = vst [vmem:[#allocation7 + $0x8] sm:$0xff] %v1497_v46  }
 0x642   :  { %v1452_v1 = vsel %vm1451_vm4, %v1447_v22, %v1554_v28  ;;  %v1453_v29 = vsel %vm1451_vm4, %v1448_v12, %v1555_v51 }
 0x643   :  { %v1492_v16 = vpack.c.bf16 %v1453_v29, %v1452_v1 }
 0x645   :  { %1493 = vst [vmem:[#allocation7] sm:$0xff] %v1492_v16  }
 0x646   :  { %1702 = shalt.err (!%p1699_p6)
}
 0x647   :  { %s1703_s11 = scalar_lea.hbm %s2565_s5, 256 }
 0x648   :  { %p1704_p7 = scmp.ne.s32.totalorder %s2565_s5, %s1703_s11  ;;  %p1707_p8 = scmp.lt.u32.totalorder %s1703_s11, %s2565_s5 }
 0x64a   :  { %p1709_p9 = pnand %p1707_p8, %p1704_p7 }
 0x64c   :  { %1712 = shalt.err (!%p1709_p9)
}
 0x64d   :  { %1475 = dma.vmem_to_hbm [thread:$0]  %s1470_s7, 256, %s2565_s5, [#allocation4], %s1723_s0, %s1723_s0, %s1724_s17  }
 0x64e   :  { %1717 = dma.done.wait [#allocation4], 256  }
 0x64f   :  { %1718 = vsyncadd [#allocation4], 4294967040 }
 0x650   :  { %1479 = vsyncpa [#allocation3], 1 }
 0x651   :  { %1480 = vsyncpa [#allocation6], 1 }
 0x652   :  { %1481 = vsyncpa [#allocation4], 1 }

</bundles_post_ra>
